<compile_context>
chip_gen: v6e
topology: v6e:2x2x1
jax: 0.10.0
libtpu: 0.0.40
codegen_flags: <defaults>
</compile_context>

<pallas_src>
import functools

import jax
import jax.numpy as jnp
from jax import lax
from jax.experimental import pallas as pl
from jax.experimental.pallas import tpu as pltpu

NUM_HEADS = 4
LANE = 128


def _round_up(x, m):
    return ((x + m - 1) // m) * m


# -------------------------- fused Pallas kernel ------------------------------

def _fused_forward_kernel(m_ref, emb_ref, vec_ref, wc_ref, *rest,
                          num_heads, num_layers, logical_h, head_dim):
    """connector Linear -> num_layers x GPT2 block -> masked-mean head.

    One grid step == one batch element. Activations stay resident in VMEM,
    hidden dims are zero-padded to 128 lanes, matmul inputs are bf16 with f32
    accumulation, LayerNorm / softmax / GELU stay f32.
    """
    layer_w = rest[:6 * num_layers]
    o_ref = rest[6 * num_layers]

    S = emb_ref.shape[1]
    Ip = emb_ref.shape[2]
    Hp = wc_ref.shape[1]
    hdp = Hp // num_heads
    eps = 1e-5
    scale = 1.0 / (float(head_dim) ** 0.5)
    inv_h = 1.0 / float(logical_h)

    vecs = vec_ref[...]                          # (V, Hp) f32 — one DMA
    m = m_ref[...].reshape(1, S)                 # (1, S) f32 padding mask

    def dense(a_bf16, w_ref, b_vec):             # bf16 MXU, f32 accumulate
        return jnp.dot(a_bf16, w_ref[...],
                       preferred_element_type=jnp.float32) + b_vec

    def layer_norm(v, g, b):
        # Padded lanes of v are exactly zero, so sums over Hp lanes divided
        # by the logical width reproduce the logical-H statistics.
        mu = jnp.sum(v, axis=-1, keepdims=True) * inv_h
        msq = jnp.sum(v * v, axis=-1, keepdims=True) * inv_h
        var = msq - mu * mu
        return (v - mu) * lax.rsqrt(var + eps) * g + b

    # ---- connector: Linear(inp -> H) ----
    x2 = dense(emb_ref[...].reshape(S, Ip), wc_ref, vecs[0])      # (S, Hp) f32

    # ---- additive attention bias (causal AND key-not-padded), built once ----
    row = lax.broadcasted_iota(jnp.int32, (S, S), 0)
    col = lax.broadcasted_iota(jnp.int32, (S, S), 1)
    keep = jnp.logical_and(col <= row, m > 0.5)                   # (S, S)
    bias = jnp.where(keep, 0.0, -1e9).astype(jnp.float32)

    for li in range(num_layers):
        wq, wk, wv, wo, w1, w2 = layer_w[6 * li: 6 * (li + 1)]
        base = 1 + 10 * li
        g1, b1 = vecs[base + 0], vecs[base + 1]
        bq, bk, bv = vecs[base + 2], vecs[base + 3], vecs[base + 4]
        bo = vecs[base + 5]
        g2, b2 = vecs[base + 6], vecs[base + 7]
        bm1, bm2 = vecs[base + 8], vecs[base + 9]

        # ---- self-attention (pre-LN, GPT2 style) ----
        h2 = layer_norm(x2, g1, b1).astype(jnp.bfloat16)   # cast once (v5e)
        q = dense(h2, wq, bq).astype(jnp.bfloat16)         # (S, Hp)
        k = dense(h2, wk, bk).astype(jnp.bfloat16)
        v = dense(h2, wv, bv).astype(jnp.bfloat16)

        wo_b = wo[...]                                     # (Hp, Hp) bf16
        attn = jnp.zeros((S, Hp), jnp.float32)
        # Each head occupies a 32-lane aligned slab (head-padded layout),
        # so slices below are lane-dense and the output projection is a
        # K=hdp bf16 matmul accumulated straight into the (S, Hp) result.
        for hi in range(num_heads):
            sl = slice(hi * hdp, (hi + 1) * hdp)
            s = lax.dot_general(q[:, sl], k[:, sl],
                                (((1,), (1,)), ((), ())),
                                preferred_element_type=jnp.float32)
            s = s * scale + bias
            s = s - jnp.max(s, axis=-1, keepdims=True)
            p = jnp.exp(s)
            p = p * pl.reciprocal(jnp.sum(p, axis=-1, keepdims=True),
                                  approx=True)
            ctx = jnp.dot(p.astype(jnp.bfloat16), v[:, sl],
                          preferred_element_type=jnp.float32)     # (S, hdp)
            attn = attn + jnp.dot(ctx.astype(jnp.bfloat16), wo_b[sl, :],
                                  preferred_element_type=jnp.float32)
        x2 = x2 + attn + bo

        # ---- MLP ----
        h2 = layer_norm(x2, g2, b2).astype(jnp.bfloat16)
        ff = dense(h2, w1, bm1)                            # (S, Fp) f32
        ff = jax.nn.gelu(ff, approximate=True)             # GPT2 'gelu_new'
        x2 = x2 + dense(ff.astype(jnp.bfloat16), w2, bm2)

    # ---- head: masked mean pooling (matmul over S) + Linear(H, 1) ----
    summed = jnp.dot(m, x2, preferred_element_type=jnp.float32)   # (1, Hp)
    cnt = jnp.maximum(jnp.sum(m, axis=-1, keepdims=True), 1.0)    # (1, 1)
    pooled = summed * pl.reciprocal(cnt, approx=True)
    wh = vecs[1 + 10 * num_layers]
    bh = vecs[2 + 10 * num_layers, 0:1]
    logit = jnp.sum(pooled * wh, axis=-1, keepdims=True) + bh     # (1, 1)
    # Lane-dense store: broadcast the logit across the 128-lane output row.
    o_ref[...] = jnp.broadcast_to(logit, o_ref.shape).astype(o_ref.dtype)


# ------------------------------ wrapper --------------------------------------

def pallas_transactions_forward(emb, mask, params, num_heads=NUM_HEADS):
    B, S, inp = emb.shape
    H = params["wc"].shape[1]
    layers = params["layers"]
    num_layers = len(layers)
    nh = num_heads
    hd = H // nh

    Hp = _round_up(H, LANE)
    Ip = _round_up(inp, LANE)
    hdp = Hp // nh
    F = layers[0]["w1"].shape[1]
    Fp = _round_up(F, LANE)
    if Fp != Hp:
        # TODO(synk): generalise packed-vector width if ff_dim pad != H pad.
        raise NotImplementedError("expected padded ff dim == padded hidden dim")

    f32 = jnp.float32
    bf = lambda a: a.astype(jnp.bfloat16)

    def padv(v):                                    # (n,) -> (Hp,)
        return jnp.pad(v.astype(f32), (0, Hp - v.shape[0]))

    def head_padv(v):                               # (H,) -> (Hp,), per-head pad
        return jnp.pad(v.astype(f32).reshape(nh, hd),
                       ((0, 0), (0, hdp - hd))).reshape(nh * hdp)

    def pad2(w, r, c):
        return jnp.pad(w, ((0, r - w.shape[0]), (0, c - w.shape[1])))

    def head_pad_cols(w):                           # (R, H) -> (R, Hp)
        r = w.shape[0]
        return jnp.pad(w.reshape(r, nh, hd),
                       ((0, 0), (0, 0), (0, hdp - hd))).reshape(r, nh * hdp)

    def head_pad_rows(w):                           # (H, C) -> (Hp, C)
        c = w.shape[1]
        return jnp.pad(w.reshape(nh, hd, c),
                       ((0, 0), (0, hdp - hd), (0, 0))).reshape(nh * hdp, c)

    # ---- packed small vectors: one (V, Hp) f32 input instead of ~20 DMAs ----
    rows = [padv(params["bc"])]
    for L in layers:
        rows += [padv(L["ln1_g"]), padv(L["ln1_b"]),
                 head_padv(L["bq"]), head_padv(L["bk"]), head_padv(L["bv"]),
                 padv(L["bo"]), padv(L["ln2_g"]), padv(L["ln2_b"]),
                 padv(L["b1"]), padv(L["b2"])]
    rows += [padv(params["wh"].reshape(-1)), padv(params["bh"])]
    vecs = jnp.stack(rows)                                      # (3+10L, Hp)

    # ---- lane-padded bf16 matmul weights ----
    w_args = [bf(pad2(params["wc"], Ip, Hp))]
    for L in layers:
        w_args += [bf(pad2(head_pad_cols(L["wq"]), Hp, Hp)),
                   bf(pad2(head_pad_cols(L["wk"]), Hp, Hp)),
                   bf(pad2(head_pad_cols(L["wv"]), Hp, Hp)),
                   bf(pad2(head_pad_rows(L["wo"]), Hp, Hp)),
                   bf(pad2(L["w1"], Hp, Fp)),
                   bf(pad2(L["w2"], Fp, Hp))]

    mask_f = mask.astype(f32).reshape(B, 1, S)
    emb_p = bf(jnp.pad(emb, ((0, 0), (0, 0), (0, Ip - inp))))   # (B, S, Ip)

    kernel = functools.partial(
        _fused_forward_kernel, num_heads=nh, num_layers=num_layers,
        logical_h=H, head_dim=hd)

    in_specs = ([pl.BlockSpec((1, 1, S), lambda b: (b, 0, 0)),
                 pl.BlockSpec((1, S, Ip), lambda b: (b, 0, 0)),
                 pl.BlockSpec(vecs.shape, lambda b: (0, 0))]
                + [pl.BlockSpec(w.shape, lambda b: (0, 0)) for w in w_args])

    out = pl.pallas_call(
        kernel,
        grid=(B,),
        out_shape=jax.ShapeDtypeStruct((B, 1, LANE), f32),
        in_specs=in_specs,
        out_specs=pl.BlockSpec((1, 1, LANE), lambda b: (b, 0, 0)),
        compiler_params=pltpu.CompilerParams(
            dimension_semantics=("parallel",)),
    )(mask_f, emb_p, vecs, *w_args)

    return out[:, 0, :1]                                        # (B, 1)


# -------------------------- plain-JAX glue -----------------------------------

def embed_features(params, cat_x, num_x):
    """EmbeddingLayer: cat lookups + num projections, concatenated on last dim."""
    parts = []
    for i, tbl in enumerate(params["cat_tables"]):
        parts.append(jnp.take(tbl, cat_x[..., i], axis=0))          # (B,S,d_i)
    for i, (w, b) in enumerate(zip(params["num_w"], params["num_b"])):
        parts.append(num_x[..., i:i + 1] * w[None, None, :] + b[None, None, :])
    return jnp.concatenate(parts, axis=-1)                          # (B,S,inp)


def transactions_model_forward(params, cat_x, num_x, mask):
    emb = embed_features(params, cat_x, num_x)                      # (B,S,inp)
    return pallas_transactions_forward(emb, mask, params)           # (B,1)


def init_params(key, cat_vocab_sizes, cat_dims, num_dims, hidden,
                num_layers=1, ff_mult=4):
    keys = iter(jax.random.split(key, 64))
    nrm = lambda shape, s=0.02: s * jax.random.normal(next(keys), shape, jnp.float32)

    params = {
        "cat_tables": [nrm((v, d)) for v, d in zip(cat_vocab_sizes, cat_dims)],
        "num_w": [nrm((d,)) for d in num_dims],
        "num_b": [jnp.zeros((d,), jnp.float32) for d in num_dims],
    }
    inp = sum(cat_dims) + sum(num_dims)
    params["wc"] = nrm((inp, hidden))
    params["bc"] = jnp.zeros((hidden,), jnp.float32)

    F = ff_mult * hidden
    layers = []
    for _ in range(num_layers):
        layers.append({
            "ln1_g": jnp.ones((hidden,), jnp.float32),
            "ln1_b": jnp.zeros((hidden,), jnp.float32),
            "wq": nrm((hidden, hidden)), "bq": jnp.zeros((hidden,), jnp.float32),
            "wk": nrm((hidden, hidden)), "bk": jnp.zeros((hidden,), jnp.float32),
            "wv": nrm((hidden, hidden)), "bv": jnp.zeros((hidden,), jnp.float32),
            "wo": nrm((hidden, hidden)), "bo": jnp.zeros((hidden,), jnp.float32),
            "ln2_g": jnp.ones((hidden,), jnp.float32),
            "ln2_b": jnp.zeros((hidden,), jnp.float32),
            "w1": nrm((hidden, F)), "b1": jnp.zeros((F,), jnp.float32),
            "w2": nrm((F, hidden)), "b2": jnp.zeros((hidden,), jnp.float32),
        })
    params["layers"] = layers

    params["wh"] = nrm((hidden, 1))
    params["bh"] = jnp.zeros((1,), jnp.float32)
    return params


# ------------------------------ main -----------------------------------------

if __name__ == "__main__":
    B, S = 2, 8
    cat_vocab_sizes = [10, 20, 30]
    cat_dims = [8, 8, 8]          # sum = 24
    num_dims = [4, 4]             # sum = 8  -> inp_size = 32
    hidden = 32                   # encoder output_size

    key = jax.random.PRNGKey(0)
    k_params, k_cat, k_num = jax.random.split(key, 3)

    params = init_params(k_params, cat_vocab_sizes, cat_dims, num_dims, hidden)

    # categorical inputs (per-feature vocab bounds), numeric inputs, padding mask
    cat_cols = []
    for kc, v in zip(jax.random.split(k_cat, len(cat_vocab_sizes)),
                     cat_vocab_sizes):
        cat_cols.append(jax.random.randint(kc, (B, S, 1), 0, v, dtype=jnp.int32))
    cat_x = jnp.concatenate(cat_cols, axis=-1)                      # (B,S,3) int32
    num_x = jax.random.normal(k_num, (B, S, len(num_dims)), jnp.float32)
    lengths = jnp.array([8, 5], jnp.int32)
    mask = (jnp.arange(S)[None, :] < lengths[:, None]).astype(jnp.int32)  # (B,S)

    fwd = jax.jit(transactions_model_forward)
    logit = fwd(params, cat_x, num_x, mask)
    jax.block_until_ready(logit)

    assert logit.shape == (B, 1) and logit.dtype == jnp.float32
    print("KERNEL_OK")
</pallas_src>

<mosaic_0001>
module attributes {stable_mosaic.version = 11 : i64} {
  func.func @_fused_forward_kernel(%arg0: i32, %arg1: memref<1x1x8xf32, #tpu.memory_space<vmem>>, %arg2: memref<1x8x128xbf16, #tpu.memory_space<vmem>>, %arg3: memref<13x128xf32, #tpu.memory_space<vmem>>, %arg4: memref<128x128xbf16, #tpu.memory_space<vmem>>, %arg5: memref<128x128xbf16, #tpu.memory_space<vmem>>, %arg6: memref<128x128xbf16, #tpu.memory_space<vmem>>, %arg7: memref<128x128xbf16, #tpu.memory_space<vmem>>, %arg8: memref<128x128xbf16, #tpu.memory_space<vmem>>, %arg9: memref<128x128xbf16, #tpu.memory_space<vmem>>, %arg10: memref<128x128xbf16, #tpu.memory_space<vmem>>, %arg11: memref<1x1x128xf32, #tpu.memory_space<vmem>>) attributes {dimension_semantics = [#tpu.dimension_semantics<parallel>], iteration_bounds = array<i64: 2>, scalar_prefetch = 0 : i64, scratch_operands = 0 : i64, tpu.core_type = #tpu.core_type<tc>, window_params = [{transform_indices = @transform_0, window_bounds = array<i64: 1, 1, 8>}, {transform_indices = @transform_1, window_bounds = array<i64: 1, 8, 128>}, {pipeline_mode = #tpu.pipeline_mode<synchronous>, transform_indices = @transform_2, window_bounds = array<i64: 13, 128>}, {pipeline_mode = #tpu.pipeline_mode<synchronous>, transform_indices = @transform_3, window_bounds = array<i64: 128, 128>}, {pipeline_mode = #tpu.pipeline_mode<synchronous>, transform_indices = @transform_4, window_bounds = array<i64: 128, 128>}, {pipeline_mode = #tpu.pipeline_mode<synchronous>, transform_indices = @transform_5, window_bounds = array<i64: 128, 128>}, {pipeline_mode = #tpu.pipeline_mode<synchronous>, transform_indices = @transform_6, window_bounds = array<i64: 128, 128>}, {pipeline_mode = #tpu.pipeline_mode<synchronous>, transform_indices = @transform_7, window_bounds = array<i64: 128, 128>}, {pipeline_mode = #tpu.pipeline_mode<synchronous>, transform_indices = @transform_8, window_bounds = array<i64: 128, 128>}, {pipeline_mode = #tpu.pipeline_mode<synchronous>, transform_indices = @transform_9, window_bounds = array<i64: 128, 128>}, {transform_indices = @transform_10, window_bounds = array<i64: 1, 1, 128>}]} {
    %c0 = arith.constant 0 : index
    %c0_0 = arith.constant 0 : index
    %0 = vector.load %arg3[%c0, %c0_0] : memref<13x128xf32, #tpu.memory_space<vmem>>, vector<13x128xf32>
    %c0_1 = arith.constant 0 : index
    %c0_2 = arith.constant 0 : index
    %c0_3 = arith.constant 0 : index
    %1 = vector.load %arg1[%c0_1, %c0_2, %c0_3] : memref<1x1x8xf32, #tpu.memory_space<vmem>>, vector<1x1x8xf32>
    %2 = vector.shape_cast %1 : vector<1x1x8xf32> to vector<1x8xf32>
    %c0_4 = arith.constant 0 : index
    %c0_5 = arith.constant 0 : index
    %c0_6 = arith.constant 0 : index
    %3 = vector.load %arg2[%c0_4, %c0_5, %c0_6] : memref<1x8x128xbf16, #tpu.memory_space<vmem>>, vector<1x8x128xbf16>
    %4 = vector.shape_cast %3 : vector<1x8x128xbf16> to vector<8x128xbf16>
    %5 = vector.extract_strided_slice %0 {offsets = [0, 0], sizes = [1, 128], strides = [1, 1]} : vector<13x128xf32> to vector<1x128xf32>
    %6 = vector.shape_cast %5 : vector<1x128xf32> to vector<128xf32>
    %c0_7 = arith.constant 0 : index
    %c0_8 = arith.constant 0 : index
    %7 = vector.load %arg4[%c0_7, %c0_8] : memref<128x128xbf16, #tpu.memory_space<vmem>>, vector<128x128xbf16>
    %cst = arith.constant dense<0.000000e+00> : vector<8x128xf32>
    %8 = tpu.matmul %4, %7, %cst {dimension_numbers = #tpu.dot_dimension_numbers<[1], [0], [0], [1], [0, 0, 1, 1], [], []>} : vector<8x128xbf16>, vector<128x128xbf16>, vector<8x128xf32> -> vector<8x128xf32>
    %9 = vector.shape_cast %6 : vector<128xf32> to vector<1x128xf32>
    %10 = vector.broadcast %9 : vector<1x128xf32> to vector<8x128xf32>
    %11 = arith.addf %8, %10 : vector<8x128xf32>
    %12 = tpu.iota {dimensions = array<i32: 0>} : vector<8x8xi32>
    %13 = tpu.iota {dimensions = array<i32: 1>} : vector<8x8xi32>
    %14 = arith.cmpi sle, %13, %12 : vector<8x8xi32>
    %cst_9 = arith.constant 5.000000e-01 : f32
    %15 = vector.broadcast %cst_9 : f32 to vector<1x8xf32>
    %16 = arith.cmpf ogt, %2, %15 : vector<1x8xf32>
    %17 = vector.broadcast %16 : vector<1x8xi1> to vector<8x8xi1>
    %18 = arith.andi %14, %17 : vector<8x8xi1>
    %cst_10 = arith.constant 0.000000e+00 : f32
    %cst_11 = arith.constant -1.000000e+09 : f32
    %19 = vector.broadcast %cst_10 : f32 to vector<8x8xf32>
    %20 = vector.broadcast %cst_11 : f32 to vector<8x8xf32>
    %21 = arith.select %18, %19, %20 : vector<8x8xi1>, vector<8x8xf32>
    %22 = vector.extract_strided_slice %0 {offsets = [1, 0], sizes = [1, 128], strides = [1, 1]} : vector<13x128xf32> to vector<1x128xf32>
    %23 = vector.shape_cast %22 : vector<1x128xf32> to vector<128xf32>
    %24 = vector.extract_strided_slice %0 {offsets = [2, 0], sizes = [1, 128], strides = [1, 1]} : vector<13x128xf32> to vector<1x128xf32>
    %25 = vector.shape_cast %24 : vector<1x128xf32> to vector<128xf32>
    %26 = vector.extract_strided_slice %0 {offsets = [3, 0], sizes = [1, 128], strides = [1, 1]} : vector<13x128xf32> to vector<1x128xf32>
    %27 = vector.shape_cast %26 : vector<1x128xf32> to vector<128xf32>
    %28 = vector.extract_strided_slice %0 {offsets = [4, 0], sizes = [1, 128], strides = [1, 1]} : vector<13x128xf32> to vector<1x128xf32>
    %29 = vector.shape_cast %28 : vector<1x128xf32> to vector<128xf32>
    %30 = vector.extract_strided_slice %0 {offsets = [5, 0], sizes = [1, 128], strides = [1, 1]} : vector<13x128xf32> to vector<1x128xf32>
    %31 = vector.shape_cast %30 : vector<1x128xf32> to vector<128xf32>
    %32 = vector.extract_strided_slice %0 {offsets = [6, 0], sizes = [1, 128], strides = [1, 1]} : vector<13x128xf32> to vector<1x128xf32>
    %33 = vector.shape_cast %32 : vector<1x128xf32> to vector<128xf32>
    %34 = vector.extract_strided_slice %0 {offsets = [7, 0], sizes = [1, 128], strides = [1, 1]} : vector<13x128xf32> to vector<1x128xf32>
    %35 = vector.shape_cast %34 : vector<1x128xf32> to vector<128xf32>
    %36 = vector.extract_strided_slice %0 {offsets = [8, 0], sizes = [1, 128], strides = [1, 1]} : vector<13x128xf32> to vector<1x128xf32>
    %37 = vector.shape_cast %36 : vector<1x128xf32> to vector<128xf32>
    %38 = vector.extract_strided_slice %0 {offsets = [9, 0], sizes = [1, 128], strides = [1, 1]} : vector<13x128xf32> to vector<1x128xf32>
    %39 = vector.shape_cast %38 : vector<1x128xf32> to vector<128xf32>
    %40 = vector.extract_strided_slice %0 {offsets = [10, 0], sizes = [1, 128], strides = [1, 1]} : vector<13x128xf32> to vector<1x128xf32>
    %41 = vector.shape_cast %40 : vector<1x128xf32> to vector<128xf32>
    %cst_12 = arith.constant dense<0.000000e+00> : vector<8xf32>
    %42 = vector.multi_reduction <add>, %11, %cst_12 [1] : vector<8x128xf32> to vector<8xf32>
    %43 = vector.shape_cast %42 : vector<8xf32> to vector<8x1xf32>
    %cst_13 = arith.constant 3.125000e-02 : f32
    %44 = vector.broadcast %cst_13 : f32 to vector<8x1xf32>
    %45 = arith.mulf %43, %44 : vector<8x1xf32>
    %46 = arith.mulf %11, %11 : vector<8x128xf32>
    %cst_14 = arith.constant dense<0.000000e+00> : vector<8xf32>
    %47 = vector.multi_reduction <add>, %46, %cst_14 [1] : vector<8x128xf32> to vector<8xf32>
    %48 = vector.shape_cast %47 : vector<8xf32> to vector<8x1xf32>
    %cst_15 = arith.constant 3.125000e-02 : f32
    %49 = vector.broadcast %cst_15 : f32 to vector<8x1xf32>
    %50 = arith.mulf %48, %49 : vector<8x1xf32>
    %51 = arith.mulf %45, %45 : vector<8x1xf32>
    %52 = arith.subf %50, %51 : vector<8x1xf32>
    %53 = vector.broadcast %45 : vector<8x1xf32> to vector<8x128xf32>
    %54 = arith.subf %11, %53 : vector<8x128xf32>
    %cst_16 = arith.constant 9.99999974E-6 : f32
    %55 = vector.broadcast %cst_16 : f32 to vector<8x1xf32>
    %56 = arith.addf %52, %55 : vector<8x1xf32>
    %57 = math.rsqrt %56 : vector<8x1xf32>
    %58 = vector.broadcast %57 : vector<8x1xf32> to vector<8x128xf32>
    %59 = arith.mulf %54, %58 : vector<8x128xf32>
    %60 = vector.shape_cast %23 : vector<128xf32> to vector<1x128xf32>
    %61 = vector.broadcast %60 : vector<1x128xf32> to vector<8x128xf32>
    %62 = arith.mulf %59, %61 : vector<8x128xf32>
    %63 = vector.shape_cast %25 : vector<128xf32> to vector<1x128xf32>
    %64 = vector.broadcast %63 : vector<1x128xf32> to vector<8x128xf32>
    %65 = arith.addf %62, %64 : vector<8x128xf32>
    %66 = arith.truncf %65 : vector<8x128xf32> to vector<8x128xbf16>
    %c0_17 = arith.constant 0 : index
    %c0_18 = arith.constant 0 : index
    %67 = vector.load %arg5[%c0_17, %c0_18] : memref<128x128xbf16, #tpu.memory_space<vmem>>, vector<128x128xbf16>
    %cst_19 = arith.constant dense<0.000000e+00> : vector<8x128xf32>
    %68 = tpu.matmul %66, %67, %cst_19 {dimension_numbers = #tpu.dot_dimension_numbers<[1], [0], [0], [1], [0, 0, 1, 1], [], []>} : vector<8x128xbf16>, vector<128x128xbf16>, vector<8x128xf32> -> vector<8x128xf32>
    %69 = vector.shape_cast %27 : vector<128xf32> to vector<1x128xf32>
    %70 = vector.broadcast %69 : vector<1x128xf32> to vector<8x128xf32>
    %71 = arith.addf %68, %70 : vector<8x128xf32>
    %72 = arith.truncf %71 : vector<8x128xf32> to vector<8x128xbf16>
    %c0_20 = arith.constant 0 : index
    %c0_21 = arith.constant 0 : index
    %73 = vector.load %arg6[%c0_20, %c0_21] : memref<128x128xbf16, #tpu.memory_space<vmem>>, vector<128x128xbf16>
    %cst_22 = arith.constant dense<0.000000e+00> : vector<8x128xf32>
    %74 = tpu.matmul %66, %73, %cst_22 {dimension_numbers = #tpu.dot_dimension_numbers<[1], [0], [0], [1], [0, 0, 1, 1], [], []>} : vector<8x128xbf16>, vector<128x128xbf16>, vector<8x128xf32> -> vector<8x128xf32>
    %75 = vector.shape_cast %29 : vector<128xf32> to vector<1x128xf32>
    %76 = vector.broadcast %75 : vector<1x128xf32> to vector<8x128xf32>
    %77 = arith.addf %74, %76 : vector<8x128xf32>
    %78 = arith.truncf %77 : vector<8x128xf32> to vector<8x128xbf16>
    %c0_23 = arith.constant 0 : index
    %c0_24 = arith.constant 0 : index
    %79 = vector.load %arg7[%c0_23, %c0_24] : memref<128x128xbf16, #tpu.memory_space<vmem>>, vector<128x128xbf16>
    %cst_25 = arith.constant dense<0.000000e+00> : vector<8x128xf32>
    %80 = tpu.matmul %66, %79, %cst_25 {dimension_numbers = #tpu.dot_dimension_numbers<[1], [0], [0], [1], [0, 0, 1, 1], [], []>} : vector<8x128xbf16>, vector<128x128xbf16>, vector<8x128xf32> -> vector<8x128xf32>
    %81 = vector.shape_cast %31 : vector<128xf32> to vector<1x128xf32>
    %82 = vector.broadcast %81 : vector<1x128xf32> to vector<8x128xf32>
    %83 = arith.addf %80, %82 : vector<8x128xf32>
    %84 = arith.truncf %83 : vector<8x128xf32> to vector<8x128xbf16>
    %c0_26 = arith.constant 0 : index
    %c0_27 = arith.constant 0 : index
    %85 = vector.load %arg8[%c0_26, %c0_27] : memref<128x128xbf16, #tpu.memory_space<vmem>>, vector<128x128xbf16>
    %cst_28 = arith.constant 0.000000e+00 : f32
    %86 = vector.broadcast %cst_28 : f32 to vector<8x128xf32>
    %87 = vector.extract_strided_slice %72 {offsets = [0, 0], sizes = [8, 32], strides = [1, 1]} : vector<8x128xbf16> to vector<8x32xbf16>
    %88 = vector.extract_strided_slice %78 {offsets = [0, 0], sizes = [8, 32], strides = [1, 1]} : vector<8x128xbf16> to vector<8x32xbf16>
    %cst_29 = arith.constant dense<0.000000e+00> : vector<8x8xf32>
    %89 = tpu.matmul %87, %88, %cst_29 {dimension_numbers = #tpu.dot_dimension_numbers<[1], [1], [0], [0], [0, 0, 1, 0], [], []>} : vector<8x32xbf16>, vector<8x32xbf16>, vector<8x8xf32> -> vector<8x8xf32>
    %cst_30 = arith.constant 0.353553385 : f32
    %90 = vector.broadcast %cst_30 : f32 to vector<8x8xf32>
    %91 = arith.mulf %89, %90 : vector<8x8xf32>
    %92 = arith.addf %91, %21 : vector<8x8xf32>
    %cst_31 = arith.constant dense<0xFF800000> : vector<8xf32>
    %93 = vector.multi_reduction <maximumf>, %92, %cst_31 [1] : vector<8x8xf32> to vector<8xf32>
    %94 = vector.shape_cast %93 : vector<8xf32> to vector<8x1xf32>
    %95 = vector.broadcast %94 : vector<8x1xf32> to vector<8x8xf32>
    %96 = arith.subf %92, %95 : vector<8x8xf32>
    %97 = math.exp %96 : vector<8x8xf32>
    %cst_32 = arith.constant dense<0.000000e+00> : vector<8xf32>
    %98 = vector.multi_reduction <add>, %97, %cst_32 [1] : vector<8x8xf32> to vector<8xf32>
    %99 = vector.shape_cast %98 : vector<8xf32> to vector<8x1xf32>
    %100 = tpu.reciprocal %99 {approx = true} : vector<8x1xf32> -> vector<8x1xf32>
    %101 = vector.broadcast %100 : vector<8x1xf32> to vector<8x8xf32>
    %102 = arith.mulf %97, %101 : vector<8x8xf32>
    %103 = arith.truncf %102 : vector<8x8xf32> to vector<8x8xbf16>
    %104 = vector.extract_strided_slice %84 {offsets = [0, 0], sizes = [8, 32], strides = [1, 1]} : vector<8x128xbf16> to vector<8x32xbf16>
    %cst_33 = arith.constant dense<0.000000e+00> : vector<8x32xf32>
    %105 = tpu.matmul %103, %104, %cst_33 {dimension_numbers = #tpu.dot_dimension_numbers<[1], [0], [0], [1], [0, 0, 1, 1], [], []>} : vector<8x8xbf16>, vector<8x32xbf16>, vector<8x32xf32> -> vector<8x32xf32>
    %106 = arith.truncf %105 : vector<8x32xf32> to vector<8x32xbf16>
    %107 = vector.extract_strided_slice %85 {offsets = [0, 0], sizes = [32, 128], strides = [1, 1]} : vector<128x128xbf16> to vector<32x128xbf16>
    %cst_34 = arith.constant dense<0.000000e+00> : vector<8x128xf32>
    %108 = tpu.matmul %106, %107, %cst_34 {dimension_numbers = #tpu.dot_dimension_numbers<[1], [0], [0], [1], [0, 0, 1, 1], [], []>} : vector<8x32xbf16>, vector<32x128xbf16>, vector<8x128xf32> -> vector<8x128xf32>
    %109 = arith.addf %86, %108 : vector<8x128xf32>
    %110 = vector.extract_strided_slice %72 {offsets = [0, 32], sizes = [8, 32], strides = [1, 1]} : vector<8x128xbf16> to vector<8x32xbf16>
    %111 = vector.extract_strided_slice %78 {offsets = [0, 32], sizes = [8, 32], strides = [1, 1]} : vector<8x128xbf16> to vector<8x32xbf16>
    %cst_35 = arith.constant dense<0.000000e+00> : vector<8x8xf32>
    %112 = tpu.matmul %110, %111, %cst_35 {dimension_numbers = #tpu.dot_dimension_numbers<[1], [1], [0], [0], [0, 0, 1, 0], [], []>} : vector<8x32xbf16>, vector<8x32xbf16>, vector<8x8xf32> -> vector<8x8xf32>
    %cst_36 = arith.constant 0.353553385 : f32
    %113 = vector.broadcast %cst_36 : f32 to vector<8x8xf32>
    %114 = arith.mulf %112, %113 : vector<8x8xf32>
    %115 = arith.addf %114, %21 : vector<8x8xf32>
    %cst_37 = arith.constant dense<0xFF800000> : vector<8xf32>
    %116 = vector.multi_reduction <maximumf>, %115, %cst_37 [1] : vector<8x8xf32> to vector<8xf32>
    %117 = vector.shape_cast %116 : vector<8xf32> to vector<8x1xf32>
    %118 = vector.broadcast %117 : vector<8x1xf32> to vector<8x8xf32>
    %119 = arith.subf %115, %118 : vector<8x8xf32>
    %120 = math.exp %119 : vector<8x8xf32>
    %cst_38 = arith.constant dense<0.000000e+00> : vector<8xf32>
    %121 = vector.multi_reduction <add>, %120, %cst_38 [1] : vector<8x8xf32> to vector<8xf32>
    %122 = vector.shape_cast %121 : vector<8xf32> to vector<8x1xf32>
    %123 = tpu.reciprocal %122 {approx = true} : vector<8x1xf32> -> vector<8x1xf32>
    %124 = vector.broadcast %123 : vector<8x1xf32> to vector<8x8xf32>
    %125 = arith.mulf %120, %124 : vector<8x8xf32>
    %126 = arith.truncf %125 : vector<8x8xf32> to vector<8x8xbf16>
    %127 = vector.extract_strided_slice %84 {offsets = [0, 32], sizes = [8, 32], strides = [1, 1]} : vector<8x128xbf16> to vector<8x32xbf16>
    %cst_39 = arith.constant dense<0.000000e+00> : vector<8x32xf32>
    %128 = tpu.matmul %126, %127, %cst_39 {dimension_numbers = #tpu.dot_dimension_numbers<[1], [0], [0], [1], [0, 0, 1, 1], [], []>} : vector<8x8xbf16>, vector<8x32xbf16>, vector<8x32xf32> -> vector<8x32xf32>
    %129 = arith.truncf %128 : vector<8x32xf32> to vector<8x32xbf16>
    %130 = vector.extract_strided_slice %85 {offsets = [32, 0], sizes = [32, 128], strides = [1, 1]} : vector<128x128xbf16> to vector<32x128xbf16>
    %cst_40 = arith.constant dense<0.000000e+00> : vector<8x128xf32>
    %131 = tpu.matmul %129, %130, %cst_40 {dimension_numbers = #tpu.dot_dimension_numbers<[1], [0], [0], [1], [0, 0, 1, 1], [], []>} : vector<8x32xbf16>, vector<32x128xbf16>, vector<8x128xf32> -> vector<8x128xf32>
    %132 = arith.addf %109, %131 : vector<8x128xf32>
    %133 = vector.extract_strided_slice %72 {offsets = [0, 64], sizes = [8, 32], strides = [1, 1]} : vector<8x128xbf16> to vector<8x32xbf16>
    %134 = vector.extract_strided_slice %78 {offsets = [0, 64], sizes = [8, 32], strides = [1, 1]} : vector<8x128xbf16> to vector<8x32xbf16>
    %cst_41 = arith.constant dense<0.000000e+00> : vector<8x8xf32>
    %135 = tpu.matmul %133, %134, %cst_41 {dimension_numbers = #tpu.dot_dimension_numbers<[1], [1], [0], [0], [0, 0, 1, 0], [], []>} : vector<8x32xbf16>, vector<8x32xbf16>, vector<8x8xf32> -> vector<8x8xf32>
    %cst_42 = arith.constant 0.353553385 : f32
    %136 = vector.broadcast %cst_42 : f32 to vector<8x8xf32>
    %137 = arith.mulf %135, %136 : vector<8x8xf32>
    %138 = arith.addf %137, %21 : vector<8x8xf32>
    %cst_43 = arith.constant dense<0xFF800000> : vector<8xf32>
    %139 = vector.multi_reduction <maximumf>, %138, %cst_43 [1] : vector<8x8xf32> to vector<8xf32>
    %140 = vector.shape_cast %139 : vector<8xf32> to vector<8x1xf32>
    %141 = vector.broadcast %140 : vector<8x1xf32> to vector<8x8xf32>
    %142 = arith.subf %138, %141 : vector<8x8xf32>
    %143 = math.exp %142 : vector<8x8xf32>
    %cst_44 = arith.constant dense<0.000000e+00> : vector<8xf32>
    %144 = vector.multi_reduction <add>, %143, %cst_44 [1] : vector<8x8xf32> to vector<8xf32>
    %145 = vector.shape_cast %144 : vector<8xf32> to vector<8x1xf32>
    %146 = tpu.reciprocal %145 {approx = true} : vector<8x1xf32> -> vector<8x1xf32>
    %147 = vector.broadcast %146 : vector<8x1xf32> to vector<8x8xf32>
    %148 = arith.mulf %143, %147 : vector<8x8xf32>
    %149 = arith.truncf %148 : vector<8x8xf32> to vector<8x8xbf16>
    %150 = vector.extract_strided_slice %84 {offsets = [0, 64], sizes = [8, 32], strides = [1, 1]} : vector<8x128xbf16> to vector<8x32xbf16>
    %cst_45 = arith.constant dense<0.000000e+00> : vector<8x32xf32>
    %151 = tpu.matmul %149, %150, %cst_45 {dimension_numbers = #tpu.dot_dimension_numbers<[1], [0], [0], [1], [0, 0, 1, 1], [], []>} : vector<8x8xbf16>, vector<8x32xbf16>, vector<8x32xf32> -> vector<8x32xf32>
    %152 = arith.truncf %151 : vector<8x32xf32> to vector<8x32xbf16>
    %153 = vector.extract_strided_slice %85 {offsets = [64, 0], sizes = [32, 128], strides = [1, 1]} : vector<128x128xbf16> to vector<32x128xbf16>
    %cst_46 = arith.constant dense<0.000000e+00> : vector<8x128xf32>
    %154 = tpu.matmul %152, %153, %cst_46 {dimension_numbers = #tpu.dot_dimension_numbers<[1], [0], [0], [1], [0, 0, 1, 1], [], []>} : vector<8x32xbf16>, vector<32x128xbf16>, vector<8x128xf32> -> vector<8x128xf32>
    %155 = arith.addf %132, %154 : vector<8x128xf32>
    %156 = vector.extract_strided_slice %72 {offsets = [0, 96], sizes = [8, 32], strides = [1, 1]} : vector<8x128xbf16> to vector<8x32xbf16>
    %157 = vector.extract_strided_slice %78 {offsets = [0, 96], sizes = [8, 32], strides = [1, 1]} : vector<8x128xbf16> to vector<8x32xbf16>
    %cst_47 = arith.constant dense<0.000000e+00> : vector<8x8xf32>
    %158 = tpu.matmul %156, %157, %cst_47 {dimension_numbers = #tpu.dot_dimension_numbers<[1], [1], [0], [0], [0, 0, 1, 0], [], []>} : vector<8x32xbf16>, vector<8x32xbf16>, vector<8x8xf32> -> vector<8x8xf32>
    %cst_48 = arith.constant 0.353553385 : f32
    %159 = vector.broadcast %cst_48 : f32 to vector<8x8xf32>
    %160 = arith.mulf %158, %159 : vector<8x8xf32>
    %161 = arith.addf %160, %21 : vector<8x8xf32>
    %cst_49 = arith.constant dense<0xFF800000> : vector<8xf32>
    %162 = vector.multi_reduction <maximumf>, %161, %cst_49 [1] : vector<8x8xf32> to vector<8xf32>
    %163 = vector.shape_cast %162 : vector<8xf32> to vector<8x1xf32>
    %164 = vector.broadcast %163 : vector<8x1xf32> to vector<8x8xf32>
    %165 = arith.subf %161, %164 : vector<8x8xf32>
    %166 = math.exp %165 : vector<8x8xf32>
    %cst_50 = arith.constant dense<0.000000e+00> : vector<8xf32>
    %167 = vector.multi_reduction <add>, %166, %cst_50 [1] : vector<8x8xf32> to vector<8xf32>
    %168 = vector.shape_cast %167 : vector<8xf32> to vector<8x1xf32>
    %169 = tpu.reciprocal %168 {approx = true} : vector<8x1xf32> -> vector<8x1xf32>
    %170 = vector.broadcast %169 : vector<8x1xf32> to vector<8x8xf32>
    %171 = arith.mulf %166, %170 : vector<8x8xf32>
    %172 = arith.truncf %171 : vector<8x8xf32> to vector<8x8xbf16>
    %173 = vector.extract_strided_slice %84 {offsets = [0, 96], sizes = [8, 32], strides = [1, 1]} : vector<8x128xbf16> to vector<8x32xbf16>
    %cst_51 = arith.constant dense<0.000000e+00> : vector<8x32xf32>
    %174 = tpu.matmul %172, %173, %cst_51 {dimension_numbers = #tpu.dot_dimension_numbers<[1], [0], [0], [1], [0, 0, 1, 1], [], []>} : vector<8x8xbf16>, vector<8x32xbf16>, vector<8x32xf32> -> vector<8x32xf32>
    %175 = arith.truncf %174 : vector<8x32xf32> to vector<8x32xbf16>
    %176 = vector.extract_strided_slice %85 {offsets = [96, 0], sizes = [32, 128], strides = [1, 1]} : vector<128x128xbf16> to vector<32x128xbf16>
    %cst_52 = arith.constant dense<0.000000e+00> : vector<8x128xf32>
    %177 = tpu.matmul %175, %176, %cst_52 {dimension_numbers = #tpu.dot_dimension_numbers<[1], [0], [0], [1], [0, 0, 1, 1], [], []>} : vector<8x32xbf16>, vector<32x128xbf16>, vector<8x128xf32> -> vector<8x128xf32>
    %178 = arith.addf %155, %177 : vector<8x128xf32>
    %179 = arith.addf %11, %178 : vector<8x128xf32>
    %180 = vector.shape_cast %33 : vector<128xf32> to vector<1x128xf32>
    %181 = vector.broadcast %180 : vector<1x128xf32> to vector<8x128xf32>
    %182 = arith.addf %179, %181 : vector<8x128xf32>
    %cst_53 = arith.constant dense<0.000000e+00> : vector<8xf32>
    %183 = vector.multi_reduction <add>, %182, %cst_53 [1] : vector<8x128xf32> to vector<8xf32>
    %184 = vector.shape_cast %183 : vector<8xf32> to vector<8x1xf32>
    %cst_54 = arith.constant 3.125000e-02 : f32
    %185 = vector.broadcast %cst_54 : f32 to vector<8x1xf32>
    %186 = arith.mulf %184, %185 : vector<8x1xf32>
    %187 = arith.mulf %182, %182 : vector<8x128xf32>
    %cst_55 = arith.constant dense<0.000000e+00> : vector<8xf32>
    %188 = vector.multi_reduction <add>, %187, %cst_55 [1] : vector<8x128xf32> to vector<8xf32>
    %189 = vector.shape_cast %188 : vector<8xf32> to vector<8x1xf32>
    %cst_56 = arith.constant 3.125000e-02 : f32
    %190 = vector.broadcast %cst_56 : f32 to vector<8x1xf32>
    %191 = arith.mulf %189, %190 : vector<8x1xf32>
    %192 = arith.mulf %186, %186 : vector<8x1xf32>
    %193 = arith.subf %191, %192 : vector<8x1xf32>
    %194 = vector.broadcast %186 : vector<8x1xf32> to vector<8x128xf32>
    %195 = arith.subf %182, %194 : vector<8x128xf32>
    %cst_57 = arith.constant 9.99999974E-6 : f32
    %196 = vector.broadcast %cst_57 : f32 to vector<8x1xf32>
    %197 = arith.addf %193, %196 : vector<8x1xf32>
    %198 = math.rsqrt %197 : vector<8x1xf32>
    %199 = vector.broadcast %198 : vector<8x1xf32> to vector<8x128xf32>
    %200 = arith.mulf %195, %199 : vector<8x128xf32>
    %201 = vector.shape_cast %35 : vector<128xf32> to vector<1x128xf32>
    %202 = vector.broadcast %201 : vector<1x128xf32> to vector<8x128xf32>
    %203 = arith.mulf %200, %202 : vector<8x128xf32>
    %204 = vector.shape_cast %37 : vector<128xf32> to vector<1x128xf32>
    %205 = vector.broadcast %204 : vector<1x128xf32> to vector<8x128xf32>
    %206 = arith.addf %203, %205 : vector<8x128xf32>
    %207 = arith.truncf %206 : vector<8x128xf32> to vector<8x128xbf16>
    %c0_58 = arith.constant 0 : index
    %c0_59 = arith.constant 0 : index
    %208 = vector.load %arg9[%c0_58, %c0_59] : memref<128x128xbf16, #tpu.memory_space<vmem>>, vector<128x128xbf16>
    %cst_60 = arith.constant dense<0.000000e+00> : vector<8x128xf32>
    %209 = tpu.matmul %207, %208, %cst_60 {dimension_numbers = #tpu.dot_dimension_numbers<[1], [0], [0], [1], [0, 0, 1, 1], [], []>} : vector<8x128xbf16>, vector<128x128xbf16>, vector<8x128xf32> -> vector<8x128xf32>
    %210 = vector.shape_cast %39 : vector<128xf32> to vector<1x128xf32>
    %211 = vector.broadcast %210 : vector<1x128xf32> to vector<8x128xf32>
    %212 = arith.addf %209, %211 : vector<8x128xf32>
    %213 = arith.mulf %212, %212 : vector<8x128xf32>
    %214 = arith.mulf %212, %213 : vector<8x128xf32>
    %cst_61 = arith.constant 4.471500e-02 : f32
    %215 = vector.broadcast %cst_61 : f32 to vector<8x128xf32>
    %216 = arith.mulf %215, %214 : vector<8x128xf32>
    %217 = arith.addf %212, %216 : vector<8x128xf32>
    %cst_62 = arith.constant 0.797884583 : f32
    %218 = vector.broadcast %cst_62 : f32 to vector<8x128xf32>
    %219 = arith.mulf %218, %217 : vector<8x128xf32>
    %220 = math.tanh %219 : vector<8x128xf32>
    %cst_63 = arith.constant 1.000000e+00 : f32
    %221 = vector.broadcast %cst_63 : f32 to vector<8x128xf32>
    %222 = arith.addf %221, %220 : vector<8x128xf32>
    %cst_64 = arith.constant 5.000000e-01 : f32
    %223 = vector.broadcast %cst_64 : f32 to vector<8x128xf32>
    %224 = arith.mulf %223, %222 : vector<8x128xf32>
    %225 = arith.mulf %212, %224 : vector<8x128xf32>
    %226 = arith.truncf %225 : vector<8x128xf32> to vector<8x128xbf16>
    %c0_65 = arith.constant 0 : index
    %c0_66 = arith.constant 0 : index
    %227 = vector.load %arg10[%c0_65, %c0_66] : memref<128x128xbf16, #tpu.memory_space<vmem>>, vector<128x128xbf16>
    %cst_67 = arith.constant dense<0.000000e+00> : vector<8x128xf32>
    %228 = tpu.matmul %226, %227, %cst_67 {dimension_numbers = #tpu.dot_dimension_numbers<[1], [0], [0], [1], [0, 0, 1, 1], [], []>} : vector<8x128xbf16>, vector<128x128xbf16>, vector<8x128xf32> -> vector<8x128xf32>
    %229 = vector.shape_cast %41 : vector<128xf32> to vector<1x128xf32>
    %230 = vector.broadcast %229 : vector<1x128xf32> to vector<8x128xf32>
    %231 = arith.addf %228, %230 : vector<8x128xf32>
    %232 = arith.addf %182, %231 : vector<8x128xf32>
    %cst_68 = arith.constant dense<0.000000e+00> : vector<1x128xf32>
    %233 = tpu.matmul %2, %232, %cst_68 {dimension_numbers = #tpu.dot_dimension_numbers<[1], [0], [0], [1], [0, 0, 1, 1], [], []>} : vector<1x8xf32>, vector<8x128xf32>, vector<1x128xf32> -> vector<1x128xf32>
    %cst_69 = arith.constant dense<0.000000e+00> : vector<1xf32>
    %234 = vector.multi_reduction <add>, %2, %cst_69 [1] : vector<1x8xf32> to vector<1xf32>
    %235 = vector.shape_cast %234 : vector<1xf32> to vector<1x1xf32>
    %cst_70 = arith.constant 1.000000e+00 : f32
    %236 = vector.broadcast %cst_70 : f32 to vector<1x1xf32>
    %237 = arith.maximumf %235, %236 : vector<1x1xf32>
    %238 = tpu.reciprocal %237 {approx = true} : vector<1x1xf32> -> vector<1x1xf32>
    %239 = vector.broadcast %238 : vector<1x1xf32> to vector<1x128xf32>
    %240 = arith.mulf %233, %239 : vector<1x128xf32>
    %241 = vector.extract_strided_slice %0 {offsets = [11, 0], sizes = [1, 128], strides = [1, 1]} : vector<13x128xf32> to vector<1x128xf32>
    %242 = vector.shape_cast %241 : vector<1x128xf32> to vector<128xf32>
    %243 = vector.extract_strided_slice %0 {offsets = [12, 0], sizes = [1, 1], strides = [1, 1]} : vector<13x128xf32> to vector<1x1xf32>
    %244 = vector.shape_cast %243 : vector<1x1xf32> to vector<1xf32>
    %245 = vector.shape_cast %242 : vector<128xf32> to vector<1x128xf32>
    %246 = arith.mulf %240, %245 : vector<1x128xf32>
    %cst_71 = arith.constant dense<0.000000e+00> : vector<1xf32>
    %247 = vector.multi_reduction <add>, %246, %cst_71 [1] : vector<1x128xf32> to vector<1xf32>
    %248 = vector.shape_cast %247 : vector<1xf32> to vector<1x1xf32>
    %249 = vector.shape_cast %244 : vector<1xf32> to vector<1x1xf32>
    %250 = arith.addf %248, %249 : vector<1x1xf32>
    %251 = vector.shape_cast %250 : vector<1x1xf32> to vector<1x1x1xf32>
    %252 = vector.broadcast %251 : vector<1x1x1xf32> to vector<1x1x128xf32>
    %c0_72 = arith.constant 0 : index
    %c0_73 = arith.constant 0 : index
    %c0_74 = arith.constant 0 : index
    %253 = vector.load %arg11[%c0_72, %c0_73, %c0_74] : memref<1x1x128xf32, #tpu.memory_space<vmem>>, vector<1x1x128xf32>
    tpu.vector_store %arg11[%c0_72, %c0_73, %c0_74], %252 {strides = array<i32>} : memref<1x1x128xf32, #tpu.memory_space<vmem>>, vector<1x1x128xf32>,
    return
  }
  func.func @transform_0(%arg0: i32) -> (i32, i32, i32) {
    %c0_i32 = arith.constant 0 : i32
    %c0_i32_0 = arith.constant 0 : i32
    %c0_i32_1 = arith.constant 0 : i32
    return %arg0, %c0_i32, %c0_i32_0 : i32, i32, i32
  }
  func.func @transform_1(%arg0: i32) -> (i32, i32, i32) {
    %c0_i32 = arith.constant 0 : i32
    %c0_i32_0 = arith.constant 0 : i32
    %c0_i32_1 = arith.constant 0 : i32
    return %arg0, %c0_i32, %c0_i32_0 : i32, i32, i32
  }
  func.func @transform_2(%arg0: i32) -> (i32, i32) {
    %c0_i32 = arith.constant 0 : i32
    %c0_i32_0 = arith.constant 0 : i32
    %c0_i32_1 = arith.constant 0 : i32
    return %c0_i32, %c0_i32_0 : i32, i32
  }
  func.func @transform_3(%arg0: i32) -> (i32, i32) {
    %c0_i32 = arith.constant 0 : i32
    %c0_i32_0 = arith.constant 0 : i32
    %c0_i32_1 = arith.constant 0 : i32
    return %c0_i32, %c0_i32_0 : i32, i32
  }
  func.func @transform_4(%arg0: i32) -> (i32, i32) {
    %c0_i32 = arith.constant 0 : i32
    %c0_i32_0 = arith.constant 0 : i32
    %c0_i32_1 = arith.constant 0 : i32
    return %c0_i32, %c0_i32_0 : i32, i32
  }
  func.func @transform_5(%arg0: i32) -> (i32, i32) {
    %c0_i32 = arith.constant 0 : i32
    %c0_i32_0 = arith.constant 0 : i32
    %c0_i32_1 = arith.constant 0 : i32
    return %c0_i32, %c0_i32_0 : i32, i32
  }
  func.func @transform_6(%arg0: i32) -> (i32, i32) {
    %c0_i32 = arith.constant 0 : i32
    %c0_i32_0 = arith.constant 0 : i32
    %c0_i32_1 = arith.constant 0 : i32
    return %c0_i32, %c0_i32_0 : i32, i32
  }
  func.func @transform_7(%arg0: i32) -> (i32, i32) {
    %c0_i32 = arith.constant 0 : i32
    %c0_i32_0 = arith.constant 0 : i32
    %c0_i32_1 = arith.constant 0 : i32
    return %c0_i32, %c0_i32_0 : i32, i32
  }
  func.func @transform_8(%arg0: i32) -> (i32, i32) {
    %c0_i32 = arith.constant 0 : i32
    %c0_i32_0 = arith.constant 0 : i32
    %c0_i32_1 = arith.constant 0 : i32
    return %c0_i32, %c0_i32_0 : i32, i32
  }
  func.func @transform_9(%arg0: i32) -> (i32, i32) {
    %c0_i32 = arith.constant 0 : i32
    %c0_i32_0 = arith.constant 0 : i32
    %c0_i32_1 = arith.constant 0 : i32
    return %c0_i32, %c0_i32_0 : i32, i32
  }
  func.func @transform_10(%arg0: i32) -> (i32, i32, i32) {
    %c0_i32 = arith.constant 0 : i32
    %c0_i32_0 = arith.constant 0 : i32
    %c0_i32_1 = arith.constant 0 : i32
    return %arg0, %c0_i32, %c0_i32_0 : i32, i32, i32
  }
}

</mosaic_0001>

<bundles_post_ra>
// kernel: transactions_model_forward.1
= control target key start
LH: loop header
LB: loop body
LE: loop exit
PB: predicated region body
PF: predicated region fallthrough
CT: control target
= control target key end

     0   :  { %s2478_s13 = smov 0   ;;  %s2910_s0 = inlined_call_operand.vmem [shape: f32[2,1,8], index: 0, kind: input, shape index: {}]   ;;  %s2911_s1 = inlined_call_operand.vmem [shape: bf16[2,8,128], index: 1, kind: input, shape index: {}]   ;;  %s2912_s2 = inlined_call_operand.vmem [shape: f32[13,128], index: 2, kind: input, shape index: {}]   ;;  %s2913_s3 = inlined_call_operand.vmem [shape: bf16[128,128], index: 3, kind: input, shape index: {}]   ;;  %s2914_s4 = inlined_call_operand.vmem [shape: bf16[128,128], index: 4, kind: input, shape index: {}]   ;;  %s2915_s5 = inlined_call_operand.vmem [shape: bf16[128,128], index: 5, kind: input, shape index: {}]   ;;  %s2916_s6 = inlined_call_operand.vmem [shape: bf16[128,128], index: 6, kind: input, shape index: {}]   ;;  %s2917_s7 = inlined_call_operand.vmem [shape: bf16[128,128], index: 7, kind: input, shape index: {}]   ;;  %s2918_s8 = inlined_call_operand.vmem [shape: bf16[128,128], index: 8, kind: input, shape index: {}]   ;;  %s2919_s9 = inlined_call_operand.vmem [shape: bf16[128,128], index: 9, kind: input, shape index: {}]   ;;  %s2920_s10 = inlined_call_operand.vmem [shape: f32[2,1,128], index: 10, kind: output, shape index: {}]  }
   0x1 LB: > { %s1945_s14 = sadd.s32 4294967295, %s2414_s13   ;;  %p1949_p0 = scmp.ge.s32.totalorder %s2414_s13, 1  ;;  %s2414_s13 = sphi %s2478_s13, %s20_s13  }
   0x2   : > { %p319_p1 = scmp.lt.s32.totalorder %s2414_s13, 3 }
   0x4   : > { %p320_p2 = pnand %p1949_p0, %p319_p1 }
   0x5   : > { %p357_p3 = scmp.lt.s32.totalorder (!%p320_p2), %s1945_s14, 1  ;;  %s2418_s11 = smov (!%p320_p2), 96  }
   0x6   : > { %323 = sbr.rel (%p320_p2) target bundleno = 3925 (0xf55), region = 60  ;;  %s2421_s17 = smov (!%p320_p2), 64  }
   0x7   : > { %s2422_s26 = smov (!%p320_p2), 32  }
   0xb   : > { %v2328_v0 = vld [vmem:[%s2913_s3 + $0x38] sm:$0xff]   ;;  %v2416_v1 = vmov 0.0   ;;  %v2329_v2 = vld [vmem:[%s2913_s3 + $0x30] sm:$0xff]   ;;  %vm2417_vm0 = vmmov 0   ;;  %s2922_s14 = smov (!%p357_p3, %s1945_s14), 1  ;;  %v2330_v3 = vld [vmem:[%s2913_s3 + $0x28] sm:$0xff]   ;;  %v388_v10 = vlaneseq }
   0xc   : > { %2106 = vmatprep.subr.bf16.mxu0 %v2416_v1  ;;  %2126 = vmatprep.subr.bf16.mxu1 %v2416_v1  ;;  %v2331_v4 = vld [vmem:[%s2913_s3 + $0x20] sm:$0xff]   ;;  %s1950_s23 = sshll.u32 %s2922_s14, 2  ;;  %v2332_v5 = vld [vmem:[%s2913_s3 + $0x18] sm:$0xff]   ;;  %v2333_v6 = vld [vmem:[%s2913_s3 + $0x10] sm:$0xff]   ;;  %vm861_vm1 = vcmask 261120   ;;  %vm926_vm2 = vcmask 1043456  }
   0xd   : > { %2107 = vmatpush3.bf16.msra.mxu0 %v2328_v0  ;;  %2122 = vmatprep.mubr.msk.bf16.mxu0 %vm2417_vm0, %v2416_v1  ;;  %v2334_v7 = vld [vmem:[%s2913_s3 + $0x8] sm:$0xff]   ;;  %v2335_v8 = vld [vmem:[%s2913_s3] sm:$0xff]   ;;  %s363_s16 = scalar_lea.vmem %s2911_s1, %s1950_s23  ;;  %v2533_v11 = vshrl.u32 %v388_v10, 7  ;;  %v2336_v21 = vld [vmem:[%s2914_s4 + $0x38] sm:$0xff]   ;;  %vm910_vm7 = vcmask 64512   ;;  %vm1865_vm8 = vcmask 57344  }
   0xe   : > { %2108 = vmatprep.subr.bf16.mxu0 %v2416_v1  ;;  %2142 = vmatprep.mubr.msk.bf16.mxu1 %vm2417_vm0, %v2416_v1  ;;  %v371_v9 = vld [vmem:[%s363_s16] sm:$0xf]  ;;  %v2337_v22 = vld [vmem:[%s2915_s5 + $0x38] sm:$0xff]   ;;  %v2338_v23 = vld [vmem:[%s2914_s4 + $0x30] sm:$0xff]   ;;  %s359_s16 = scalar_lea.vmem %s2910_s0, %s2922_s14  ;;  %vm1876_vm9 = vcmask 1040384  }
   0xf   : > { %v2536_v12 = vsub.s32 0, %v2533_v11  ;;  %v2541_v13 = vld [vmem:[%s2912_s2] sm:$0xff]  ;;  %2127 = vmatpush3.bf16.msra.mxu1 %v2336_v21  ;;  %v2339_v24 = vld [vmem:[%s2915_s5 + $0x30] sm:$0xff]   ;;  %v2340_v25 = vld [vmem:[%s2914_s4 + $0x28] sm:$0xff]   ;;  %v509_v44 = vsub.s32 1, %v2533_v11  ;;  %v514_v45 = vsub.s32 2, %v2533_v11 }
  0x10   : > { %2128 = vmatprep.subr.bf16.mxu1 %v2416_v1  ;;  %v2341_v26 = vld [vmem:[%s2915_s5 + $0x28] sm:$0xff]   ;;  %v2342_v27 = vld [vmem:[%s2914_s4 + $0x20] sm:$0xff]   ;;  %v2344_v29 = vld [vmem:[%s2914_s4 + $0x18] sm:$0xff]   ;;  %v645_v62 = vsub.s32 4, %v2533_v11  ;;  %v536_v63 = vsub.s32 3, %v2533_v11  ;;  %v754_v21 = vsub.s32 5, %v2533_v11 }
  0x11   : > { %2109 = vmatpush3.bf16.msra.mxu0 %v2329_v2  ;;  %v391_v14 = vrot.slane %v2541_v13, %v2536_v12  ;;  %v2343_v28 = vld [vmem:[%s2915_s5 + $0x20] sm:$0xff]   ;;  %v2345_v30 = vld [vmem:[%s2915_s5 + $0x18] sm:$0xff]   ;;  %v2346_v31 = vld [vmem:[%s2914_s4 + $0x10] sm:$0xff]   ;;  %v510_v47 = vrot.slane %v2541_v13, %v509_v44  ;;  %v515_v50 = vrot.slane %v2541_v13, %v514_v45 }
  0x12   : > { %2110 = vmatprep.subr.bf16.mxu0 %v2416_v1  ;;  %v2347_v32 = vld [vmem:[%s2915_s5 + $0x10] sm:$0xff]   ;;  %v2348_v33 = vld [vmem:[%s2914_s4 + $0x8] sm:$0xff]   ;;  %v2350_v35 = vld [vmem:[%s2914_s4] sm:$0xff]   ;;  %v646_v0 = vrot.slane %v2541_v13, %v645_v62  ;;  %v537_v2 = vrot.slane %v2541_v13, %v536_v63 }
  0x13   : > { %2129 = vmatpush3.bf16.msra.mxu1 %v2338_v23  ;;  %v2349_v34 = vld [vmem:[%s2915_s5 + $0x8] sm:$0xff]   ;;  %v2351_v36 = vld [vmem:[%s2915_s5] sm:$0xff]   ;;  %v2352_v53 = vld [vmem:[%s2916_s6 + $0x38] sm:$0xff]  }
  0x14   : > { %2130 = vmatprep.subr.bf16.mxu1 %v2416_v1  ;;  %v2353_v55 = vld [vmem:[%s2916_s6 + $0x30] sm:$0xff]   ;;  %v2354_v56 = vld [vmem:[%s2916_s6 + $0x28] sm:$0xff]   ;;  %v2355_v57 = vld [vmem:[%s2916_s6 + $0x20] sm:$0xff]  }
  0x15   : > { %2111 = vmatpush3.bf16.msra.mxu0 %v2330_v3  ;;  %v2356_v58 = vld [vmem:[%s2916_s6 + $0x18] sm:$0xff]   ;;  %v2357_v59 = vld [vmem:[%s2916_s6 + $0x10] sm:$0xff]   ;;  %v2358_v60 = vld [vmem:[%s2916_s6 + $0x8] sm:$0xff]  }
  0x16   : > { %2112 = vmatprep.subr.bf16.mxu0 %v2416_v1  ;;  %v2359_v61 = vld [vmem:[%s2916_s6] sm:$0xff]  }
  0x17   : > { %2131 = vmatpush3.bf16.msra.mxu1 %v2340_v25 }
  0x18   : > { %2132 = vmatprep.subr.bf16.mxu1 %v2416_v1 }
  0x19   : > { %2113 = vmatpush3.bf16.msra.mxu0 %v2331_v4 }
  0x1a   : > { %2114 = vmatprep.subr.bf16.mxu0 %v2416_v1 }
  0x1b   : > { %2133 = vmatpush3.bf16.msra.mxu1 %v2342_v27 }
  0x1c   : > { %2134 = vmatprep.subr.bf16.mxu1 %v2416_v1 }
  0x1d   : > { %2115 = vmatpush3.bf16.msra.mxu0 %v2332_v5 }
  0x1e   : > { %2116 = vmatprep.subr.bf16.mxu0 %v2416_v1 }
  0x1f   : > { %2135 = vmatpush3.bf16.msra.mxu1 %v2344_v29 }
  0x20   : > { %2136 = vmatprep.subr.bf16.mxu1 %v2416_v1 }
  0x21   : > { %2117 = vmatpush3.bf16.msra.mxu0 %v2333_v6 }
  0x22   : > { %2118 = vmatprep.subr.bf16.mxu0 %v2416_v1 }
  0x23   : > { %2137 = vmatpush3.bf16.msra.mxu1 %v2346_v31 }
  0x24   : > { %2138 = vmatprep.subr.bf16.mxu1 %v2416_v1 }
  0x25   : > { %2119 = vmatpush3.bf16.msra.mxu0 %v2334_v7 }
  0x26   : > { %2120 = vmatprep.subr.bf16.mxu0 %v2416_v1 }
  0x27   : > { %2139 = vmatpush3.bf16.msra.mxu1 %v2348_v33 }
  0x28   : > { %2140 = vmatprep.subr.bf16.mxu1 %v2416_v1 }
  0x29   : > { %2121 = vmatpush3.bf16.msra.mxu0 %v2335_v8 }
  0x2a   : > { %2146 = vmatprep.subr.bf16.mxu0 %v2416_v1 }
  0x2b   : > { %2141 = vmatpush3.bf16.msra.mxu1 %v2350_v35 }
  0x2c   : > { %2123 = vmatmul.mubr.bf16.vlgmr.msra.gmra.mxu0 %v371_v9  ;;  %2166 = vmatprep.subr.bf16.mxu1 %v2416_v1 }
  0x2d   : > { %2162 = vmatprep.mubr.msk.bf16.mxu0 %vm2417_vm0, %v2416_v1  ;;  %2147 = vmatpush3.bf16.msra.mxu0 %v2337_v22  ;;  %v755_v22 = vrot.slane %v2541_v13, %v754_v21 }
  0x2e   : > { %2148 = vmatprep.subr.bf16.mxu0 %v2416_v1 }
  0x31   : > { %2149 = vmatpush3.bf16.msra.mxu0 %v2339_v24 }
  0x32   : > { %2150 = vmatprep.subr.bf16.mxu0 %v2416_v1 }
  0x35   : > { %2151 = vmatpush3.bf16.msra.mxu0 %v2341_v26 }
  0x36   : > { %2152 = vmatprep.subr.bf16.mxu0 %v2416_v1 }
  0x39   : > { %2153 = vmatpush3.bf16.msra.mxu0 %v2343_v28 }
  0x3a   : > { %2154 = vmatprep.subr.bf16.mxu0 %v2416_v1 }
  0x3d   : > { %2155 = vmatpush3.bf16.msra.mxu0 %v2345_v30  ;;  %v2419_v30 = vmov 0  }
  0x3e   : > { %2156 = vmatprep.subr.bf16.mxu0 %v2416_v1  ;;  %2326 = vset.pattern.permute.xlu1 %v2419_v30 }
  0x3f   : > { %2327 = vset.pattern.permute.xlu0 %v2419_v30 }
  0x41   : > { %2157 = vmatpush3.bf16.msra.mxu0 %v2347_v32 }
  0x42   : > { %2158 = vmatprep.subr.bf16.mxu0 %v2416_v1 }
  0x45   : > { %2159 = vmatpush3.bf16.msra.mxu0 %v2349_v34  ;;  %v2696_v34 = vld [vmem:[%s359_s16] sm:$0x1] }
  0x46   : > { %2160 = vmatprep.subr.bf16.mxu0 %v2416_v1  ;;  %vm485_vm3 = vcmp.gt.f32.partialorder %v2696_v34, 0.5 }
  0x47   : > { %v486_v35 = vsel %vm485_vm3, 1, %v2419_v30 }
  0x49   : > { %2161 = vmatpush3.bf16.msra.mxu0 %v2351_v36  ;;  %v483_v36 = vand.u32 127, %v388_v10 }
  0x4a   : > { %2186 = vmatprep.subr.bf16.mxu0 %v2416_v1 }
  0x4b   : > { %vm484_vm4 = vcmp.le.s32.totalorder %v483_v36, %v2533_v11 }
  0xec   : > { %v474_v15 = vpop.f32.mrf.mxu0 }
  0xed   : > { %v2545_v16 = vadd.f32 %v474_v15, %v391_v14 }
  0xee   : > { %v2124_v17 = vpop.f32.mrf.mxu0 }
  0xef   : > { %494 = vadd.xlane.f32.xlu0 %v2545_v16  ;;  %v497_v19 = vmul.f32 %v2545_v16, %v2545_v16 }
  0xf0   : > { %v477_v18 = vpop.f32.mrf.mxu0 }
  0xf2   : > { %v2125_v20 = vpop.f32.mrf.mxu0 }
  0xf3   : > { %498 = vadd.xlane.f32.xlu0 %v497_v19 }
 0x178   : > { %v495_v37 = vpop.xlane.xlu0 %494 }
 0x179   : > { %v496_v38 = vmul.f32 0.03125, %v495_v37  ;;  %v490_v37 = vrot.slane %v486_v35, %v2536_v12 }
 0x17b   : > { %v501_v40 = vmul.f32 %v496_v38, %v496_v38  ;;  %v503_v46 = vsub.f32 %v2545_v16, %v496_v38  ;;  %vm491_vm5 = vcmp.eq.s32.totalorder %v490_v37, 1 }
 0x17c   : > { %v499_v39 = vpop.xlane.xlu0 %498  ;;  %vm492_vm6 = vmand %vm484_vm4, %vm491_vm5 }
 0x17d   : > { %v500_v41 = vmul.f32 0.03125, %v499_v39  ;;  %v2420_v39 = vmov -1e+09  }
 0x17f   : > { %v502_v42 = vsub.f32 %v500_v41, %v501_v40  ;;  %v2702_v40 = vsel %vm492_vm6, 0.0, %v2420_v39 }
 0x181   : > { %v504_v43 = vadd.f32 1e-05, %v502_v42 }
 0x183   : > { %2384 = vrsqrt.f32 %v504_v43 }
 0x190   : > { %v2385_v48 = vpop.eup %2384 }
 0x191   : > { %v506_v49 = vmul.f32 %v2385_v48, %v503_v46 }
 0x193   : > { %v511_v51 = vmul.f32 %v510_v47, %v506_v49 }
 0x195   : > { %v516_v52 = vadd.f32 %v515_v50, %v511_v51 }
 0x197   : > { %v517_v54 = vpack.c.bf16 %v516_v52, %v516_v52 }
 0x199   : > { %2143 = vmatmul.mubr.bf16.vlgmr.msra.gmra.mxu1 %v517_v54  ;;  %2163 = vmatmul.mubr.bf16.vlgmr.msra.gmra.mxu0 %v517_v54 }
 0x19a   : > { %2167 = vmatpush3.bf16.msra.mxu1 %v2352_v53  ;;  %2182 = vmatprep.mubr.msk.bf16.mxu1 %vm2417_vm0, %v2416_v1 }
 0x19b   : > { %2168 = vmatprep.subr.bf16.mxu1 %v2416_v1  ;;  %2188 = vmatprep.mubr.msk.bf16.mxu0 %vm2417_vm0, %v2416_v1 }
 0x19e   : > { %2169 = vmatpush3.bf16.msra.mxu1 %v2353_v55 }
 0x19f   : > { %2170 = vmatprep.subr.bf16.mxu1 %v2416_v1 }
 0x1a2   : > { %2171 = vmatpush3.bf16.msra.mxu1 %v2354_v56 }
 0x1a3   : > { %2172 = vmatprep.subr.bf16.mxu1 %v2416_v1 }
 0x1a6   : > { %2173 = vmatpush3.bf16.msra.mxu1 %v2355_v57 }
 0x1a7   : > { %2174 = vmatprep.subr.bf16.mxu1 %v2416_v1 }
 0x1aa   : > { %2175 = vmatpush3.bf16.msra.mxu1 %v2356_v58 }
 0x1ab   : > { %2176 = vmatprep.subr.bf16.mxu1 %v2416_v1 }
 0x1ae   : > { %2177 = vmatpush3.bf16.msra.mxu1 %v2357_v59 }
 0x1af   : > { %2178 = vmatprep.subr.bf16.mxu1 %v2416_v1 }
 0x1b2   : > { %2179 = vmatpush3.bf16.msra.mxu1 %v2358_v60 }
 0x1b3   : > { %2180 = vmatprep.subr.bf16.mxu1 %v2416_v1 }
 0x1b6   : > { %2181 = vmatpush3.bf16.msra.mxu1 %v2359_v61 }
 0x1b7   : > { %2192 = vmatprep.subr.bf16.mxu1 %v2416_v1 }
 0x1b9   : > { %2183 = vmatmul.mubr.bf16.vlgmr.msra.gmra.mxu1 %v517_v54 }
 0x1ba   : > { %2194 = vmatprep.mubr.msk.bf16.mxu1 %vm2417_vm0, %v2416_v1 }
 0x259   : > { %v620_v3 = vpop.f32.mrf.mxu1  ;;  %v729_v4 = vpop.f32.mrf.mxu0 }
 0x25a   : > { %v730_v5 = vadd.f32 %v729_v4, %v646_v0  ;;  %v621_v8 = vadd.f32 %v620_v3, %v537_v2 }
 0x25b   : > { %v2144_v6 = vpop.f32.mrf.mxu1  ;;  %v2164_v7 = vpop.f32.mrf.mxu0 }
 0x25c   : > { %v2665_v9 = vpack.c.bf16 %v730_v5, %v730_v5  ;;  %v2671_v20 = vpack.c.bf16 %v621_v8, %v621_v8  ;;  %v2362_v6 = vld [vmem:[%s2917_s7 + $0x18] sm:$0xff]   ;;  %v2363_v7 = vld [vmem:[%s2917_s7 + $0x10] sm:$0xff]  }
 0x25d   : > { %v623_v14 = vpop.f32.mrf.mxu1  ;;  %v732_v15 = vpop.f32.mrf.mxu0 }
 0x25e   : > { %975 = vrot.lane.b32.xlu1 %v2665_v9, %s2418_s11  ;;  %v866_v17 = vsel %vm861_vm1, %v2665_v9, 0 }
 0x25f   : > { %v2145_v18 = vpop.f32.mrf.mxu1  ;;  %v2165_v19 = vpop.f32.mrf.mxu0  ;;  %2187 = vmatpush3.bf16.xpose.msra.mxu0 %v866_v17 }
 0x260   : > { %2198 = vmatprep.subr.bf16.mxu0 %v2416_v1  ;;  %v2360_v19 = vld [vmem:[%s2917_s7 + $0x8] sm:$0xff]  }
 0x262   : > { %972 = vrot.lane.b32.xlu1 %v2671_v20, %s2418_s11 }
 0x266   : > { %2189 = vmatmul.mubr.msk.bf16.vlgmr.msra.gmra.mxu0 %vm861_vm1, %v2671_v20 }
 0x267   : > { %2200 = vmatprep.mubr.msk.bf16.mxu0 %vm2417_vm0, %v2416_v1 }
 0x279   : > { %v838_v23 = vpop.f32.mrf.mxu1 }
 0x27a   : > { %v839_v24 = vadd.f32 %v838_v23, %v755_v22  ;;  %v2361_v22 = vld [vmem:[%s2917_s7] sm:$0xff]  }
 0x27b   : > { %v2184_v25 = vpop.f32.mrf.mxu1 }
 0x27c   : > { %v2682_v26 = vpack.c.bf16 %v839_v24, %v839_v24 }
 0x27d   : > { %v841_v27 = vpop.f32.mrf.mxu1 }
 0x27e   : > { %v928_v28 = vsel %vm926_vm2, %v2682_v26, 0 }
 0x27f   : > { %v2185_v29 = vpop.f32.mrf.mxu1  ;;  %2193 = vmatpush3.bf16.msra.mxu1 %v928_v28 }
 0x280   : > { %2204 = vmatprep.subr.bf16.mxu1 %v2416_v1 }
 0x2d0   : > { %v976_v31 = vpop.permute.xlu1 %975 }
 0x2d1   : > { %v981_v32 = vsel %vm861_vm1, %v976_v31, 0 }
 0x2d2   : > { %2199 = vmatpush3.bf16.xpose.msra.mxu0 %v981_v32 }
 0x2d3   : > { %2210 = vmatprep.subr.bf16.mxu0 %v2416_v1 }
 0x2d4   : > { %v973_v33 = vpop.permute.xlu1 %972 }
 0x2d9   : > { %2201 = vmatmul.mubr.msk.bf16.vlgmr.msra.gmra.mxu0 %vm861_vm1, %v973_v33 }
 0x2da   : > { %2214 = vmatprep.mubr.msk.bf16.mxu0 %vm2417_vm0, %v2416_v1  ;;  %2211 = vmatpush3.bf16.msra.mxu0 %v2362_v6 }
 0x2db   : > { %2212 = vmatprep.subr.bf16.mxu0 %v2416_v1 }
 0x2de   : > { %2213 = vmatpush3.bf16.msra.mxu0 %v2363_v7 }
 0x2df   : > { %2226 = vmatprep.subr.bf16.mxu0 %v2416_v1 }
 0x326   : > { %v902_v38 = vpop.f32.mrf.mxu0 }
 0x327   : > { %v908_v41 = vmul.f32 0.35355338, %v902_v38 }
 0x328   : > { %v2190_v42 = vpop.f32.mrf.mxu0 }
 0x329   : > { %v909_v43 = vadd.f32 %v908_v41, %v2702_v40 }
 0x32a   : > { %v905_v46 = vpop.f32.mrf.mxu0 }
 0x32b   : > { %v911_v47 = vsel %vm910_vm7, %v909_v43, -inf }
 0x32c   : > { %v2191_v48 = vpop.f32.mrf.mxu0  ;;  %912 = vmax.xlane.f32.xlu0 %v911_v47 }
 0x399   : > { %v1017_v10 = vpop.f32.mrf.mxu0 }
 0x39a   : > { %v1023_v49 = vmul.f32 0.35355338, %v1017_v10 }
 0x39b   : > { %v2202_v50 = vpop.f32.mrf.mxu0 }
 0x39c   : > { %v1024_v51 = vadd.f32 %v1023_v49, %v2702_v40 }
 0x39d   : > { %v1020_v52 = vpop.f32.mrf.mxu0 }
 0x39e   : > { %v1025_v53 = vsel %vm910_vm7, %v1024_v51, -inf }
 0x39f   : > { %v2203_v54 = vpop.f32.mrf.mxu0  ;;  %1026 = vmax.xlane.f32.xlu1 %v1025_v53 }
 0x3b0   : > { %1197 = vrot.lane.b32.xlu1 %v2671_v20, %s2421_s17 }
 0x3b5   : > { %v913_v55 = vpop.xlane.xlu0 %912 }
 0x3b6   : > { %v914_v56 = vsub.f32 %v909_v43, %v913_v55 }
 0x3b8   : > { %v915_v57 = vmul.f32 1.442695, %v914_v56 }
 0x3ba   : > { %2386 = vpow2.f32 %v915_v57 }
 0x3c7   : > { %v2387_v58 = vpop.eup %2386 }
 0x3c8   : > { %v917_v59 = vsel %vm910_vm7, %v2387_v58, 0.0 }
 0x3c9   : > { %918 = vadd.xlane.f32.xlu0 %v917_v59 }
 0x428   : > { %v1027_v60 = vpop.xlane.xlu1 %1026 }
 0x429   : > { %v1028_v61 = vsub.f32 %v1024_v51, %v1027_v60 }
 0x42b   : > { %v1029_v62 = vmul.f32 1.442695, %v1028_v61 }
 0x42c   : > { %v1198_v37 = vpop.permute.xlu1 %1197 }
 0x42d   : > { %2388 = vpow2.f32 %v1029_v62 }
 0x43a   : > { %v2389_v63 = vpop.eup %2388 }
 0x43b   : > { %v1031_v0 = vsel %vm910_vm7, %v2389_v63, 0.0 }
 0x43c   : > { %1032 = vadd.xlane.f32.xlu0 %v1031_v0 }
 0x452   : > { %1038 = vrot.lane.b32.xlu0 %v2682_v26, %s2418_s11  ;;  %v919_v2 = vpop.xlane.xlu0 %918 }
 0x453   : > { %2390 = vrcp.f32 %v919_v2 }
 0x456   : > { %1199 = vrot.lane.b32.xlu0 %v2665_v9, %s2421_s17 }
 0x460   : > { %v2391_v3 = vpop.eup %2390 }
 0x461   : > { %v921_v4 = vmul.f32 %v2391_v3, %v2387_v58 }
 0x463   : > { %v922_v5 = vpack.c.bf16 %v921_v4, %v921_v4 }
 0x465   : > { %2195 = vmatmul.mubr.msk.bf16.vlgmr.msra.gmra.mxu1 %vm910_vm7, %v922_v5  ;;  %v2365_v5 = vld [vmem:[%s2917_s7 + $0x20] sm:$0xff]  }
 0x466   : > { %2206 = vmatprep.mubr.msk.bf16.mxu1 %vm2417_vm0, %v2416_v1 }
 0x4c5   : > { %v1033_v8 = vpop.xlane.xlu0 %1032 }
 0x4c6   : > { %2392 = vrcp.f32 %v1033_v8 }
 0x4c9   : > { %v1039_v14 = vpop.permute.xlu0 %1038 }
 0x4ca   : > { %v1044_v15 = vsel %vm926_vm2, %v1039_v14, 0 }
 0x4cb   : > { %2205 = vmatpush3.bf16.msra.mxu1 %v1044_v15 }
 0x4cc   : > { %2218 = vmatprep.subr.bf16.mxu1 %v2416_v1 }
 0x4cd   : > { %v1200_v29 = vpop.permute.xlu0 %1199 }
 0x4ce   : > { %v1205_v33 = vsel %vm861_vm1, %v1200_v29, 0 }
 0x4d3   : > { %v2393_v17 = vpop.eup %2392 }
 0x4d4   : > { %v1035_v18 = vmul.f32 %v2393_v17, %v2389_v63 }
 0x4d6   : > { %v1036_v21 = vpack.c.bf16 %v1035_v18, %v1035_v18 }
 0x4d8   : > { %2207 = vmatmul.mubr.msk.bf16.vlgmr.msra.gmra.mxu1 %vm910_vm7, %v1036_v21 }
 0x4d9   : > { %2219 = vmatpush3.bf16.msra.mxu1 %v2360_v19  ;;  %2222 = vmatprep.mubr.msk.bf16.mxu1 %vm2417_vm0, %v2416_v1 }
 0x4da   : > { %2220 = vmatprep.subr.bf16.mxu1 %v2416_v1 }
 0x4dd   : > { %2221 = vmatpush3.bf16.msra.mxu1 %v2361_v22 }
 0x4de   : > { %2232 = vmatprep.subr.bf16.mxu1 %v2416_v1 }
 0x525   : > { %v964_v23 = vpop.f32.mrf.mxu1 }
 0x526   : > { %v970_v24 = vpack.c.bf16 %v964_v23, %v964_v23 }
 0x527   : > { %v2196_v25 = vpop.f32.mrf.mxu1 }
 0x528   : > { %2223 = vmatmul.mubr.msk.bf16.vlgmr.msra.gmra.mxu1 %vm861_vm1, %v970_v24 }
 0x529   : > { %v967_v27 = vpop.f32.mrf.mxu1  ;;  %2234 = vmatprep.mubr.msk.bf16.mxu1 %vm2417_vm0, %v2416_v1 }
 0x52b   : > { %v2197_v28 = vpop.f32.mrf.mxu1 }
 0x598   : > { %v1080_v30 = vpop.f32.mrf.mxu1 }
 0x599   : > { %v1086_v31 = vpack.c.bf16 %v1080_v30, %v1080_v30 }
 0x59a   : > { %v2208_v32 = vpop.f32.mrf.mxu1 }
 0x59b   : > { %2215 = vmatmul.mubr.msk.bf16.vlgmr.msra.gmra.mxu0 %vm861_vm1, %v1086_v31 }
 0x59c   : > { %2227 = vmatpush3.bf16.xpose.msra.mxu0 %v1205_v33  ;;  %v1083_v35 = vpop.f32.mrf.mxu1  ;;  %2228 = vmatprep.mubr.msk.bf16.mxu0 %vm2417_vm0, %v2416_v1 }
 0x59d   : > { %2238 = vmatprep.subr.bf16.mxu0 %v2416_v1 }
 0x59e   : > { %v2209_v36 = vpop.f32.mrf.mxu1 }
 0x5a3   : > { %2229 = vmatmul.mubr.msk.bf16.vlgmr.msra.gmra.mxu0 %vm861_vm1, %v1198_v37  ;;  %v2366_v37 = vld [vmem:[%s2917_s7 + $0x38] sm:$0xff]  }
 0x5a4   : > { %2242 = vmatprep.mubr.msk.bf16.mxu0 %vm2417_vm0, %v2416_v1 }
 0x5e8   : > { %v2751_v38 = vpop.f32.mrf.mxu1 }
 0x5ea   : > { %v2224_v39 = vpop.f32.mrf.mxu1 }
 0x5ec   : > { %v1194_v41 = vpop.f32.mrf.mxu1 }
 0x5ee   : > { %v2225_v42 = vpop.f32.mrf.mxu1 }
 0x65b   : > { %v2753_v43 = vpop.f32.mrf.mxu0 }
 0x65c   : > { %v1192_v32 = vadd.f32 %v2751_v38, %v2753_v43  ;;  %v2367_v38 = vld [vmem:[%s2917_s7 + $0x30] sm:$0xff]  }
 0x65d   : > { %v2216_v46 = vpop.f32.mrf.mxu0 }
 0x65f   : > { %v1139_v47 = vpop.f32.mrf.mxu0 }
 0x661   : > { %v2217_v48 = vpop.f32.mrf.mxu0 }
 0x663   : > { %v1241_v10 = vpop.f32.mrf.mxu0 }
 0x664   : > { %v1247_v49 = vmul.f32 0.35355338, %v1241_v10 }
 0x665   : > { %v2230_v50 = vpop.f32.mrf.mxu0 }
 0x666   : > { %v1248_v51 = vadd.f32 %v1247_v49, %v2702_v40 }
 0x667   : > { %v1244_v52 = vpop.f32.mrf.mxu0 }
 0x668   : > { %v1249_v53 = vsel %vm910_vm7, %v1248_v51, -inf }
 0x669   : > { %1250 = vmax.xlane.f32.xlu0 %v1249_v53  ;;  %v2231_v54 = vpop.f32.mrf.mxu0 }
 0x67f   : > { %1261 = vrot.lane.b32.xlu0 %v2682_v26, %s2421_s17  ;;  %s366_s17 = scalar_lea.vmem %s2920_s10, %s2922_s14 }
 0x683   : > { %1366 = vrot.lane.b32.xlu0 %v2671_v20, %s2422_s26  ;;  %v2364_v20 = vld [vmem:[%s2917_s7 + $0x28] sm:$0xff]  }
 0x684   : > { %2239 = vmatpush3.bf16.msra.mxu0 %v2364_v20  ;;  %v2370_v20 = vld [vmem:[%s2918_s8 + $0x28] sm:$0xff]  }
 0x685   : > { %2240 = vmatprep.subr.bf16.mxu0 %v2416_v1 }
 0x688   : > { %2241 = vmatpush3.bf16.msra.mxu0 %v2365_v5 }
 0x689   : > { %2252 = vmatprep.subr.bf16.mxu0 %v2416_v1 }
 0x6f2   : > { %v1251_v55 = vpop.xlane.xlu0 %1250 }
 0x6f3   : > { %v1252_v56 = vsub.f32 %v1248_v51, %v1251_v55  ;;  %v1538_v51 = vsub.s32 6, %v2533_v11 }
 0x6f5   : > { %v1253_v57 = vmul.f32 1.442695, %v1252_v56  ;;  %v1539_v54 = vrot.slane %v2541_v13, %v1538_v51 }
 0x6f6   : > { %v1262_v58 = vpop.permute.xlu0 %1261 }
 0x6f7   : > { %2394 = vpow2.f32 %v1253_v57  ;;  %v1267_v59 = vsel %vm926_vm2, %v1262_v58, 0 }
 0x6f8   : > { %2233 = vmatpush3.bf16.msra.mxu1 %v1267_v59 }
 0x6f9   : > { %2246 = vmatprep.subr.bf16.mxu1 %v2416_v1 }
 0x704   : > { %v2395_v60 = vpop.eup %2394 }
 0x705   : > { %v1255_v61 = vsel %vm910_vm7, %v2395_v60, 0.0 }
 0x706   : > { %1256 = vadd.xlane.f32.xlu1 %v1255_v61  ;;  %v2368_v61 = vld [vmem:[%s2918_s8 + $0x38] sm:$0xff]  }
 0x717   : > { %1368 = vrot.lane.b32.xlu1 %v2665_v9, %s2422_s26  ;;  %v1367_v9 = vpop.permute.xlu0 %1366 }
 0x78f   : > { %v1257_v62 = vpop.xlane.xlu1 %1256 }
 0x790   : > { %2396 = vrcp.f32 %v1257_v62  ;;  %v2371_v62 = vld [vmem:[%s2918_s8 + $0x20] sm:$0xff]  }
 0x793   : > { %v1369_v2 = vpop.permute.xlu1 %1368 }
 0x794   : > { %v1374_v4 = vsel %vm861_vm1, %v1369_v2, 0  ;;  %v2374_v2 = vld [vmem:[%s2918_s8 + $0x8] sm:$0xff]  }
 0x79d   : > { %v2397_v63 = vpop.eup %2396 }
 0x79e   : > { %v1259_v0 = vmul.f32 %v2397_v63, %v2395_v60  ;;  %v2372_v63 = vld [vmem:[%s2918_s8 + $0x18] sm:$0xff]  }
 0x7a0   : > { %v1260_v3 = vpack.c.bf16 %v1259_v0, %v1259_v0  ;;  %v2373_v0 = vld [vmem:[%s2918_s8 + $0x10] sm:$0xff]  }
 0x7a2   : > { %2235 = vmatmul.mubr.msk.bf16.vlgmr.msra.gmra.mxu1 %vm910_vm7, %v1260_v3  ;;  %v2375_v3 = vld [vmem:[%s2918_s8] sm:$0xff]  }
 0x7a3   : > { %2247 = vmatpush3.bf16.xpose.msra.mxu1 %v1374_v4  ;;  %2248 = vmatprep.mubr.msk.bf16.mxu1 %vm2417_vm0, %v2416_v1 }
 0x7a4   : > { %2258 = vmatprep.subr.bf16.mxu1 %v2416_v1 }
 0x7aa   : > { %2249 = vmatmul.mubr.msk.bf16.vlgmr.msra.gmra.mxu1 %vm861_vm1, %v1367_v9 }
 0x7ab   : > { %2262 = vmatprep.mubr.msk.bf16.mxu1 %vm2417_vm0, %v2416_v1  ;;  %2259 = vmatpush3.bf16.msra.mxu1 %v2366_v37 }
 0x7ac   : > { %2260 = vmatprep.subr.bf16.mxu1 %v2416_v1 }
 0x7af   : > { %2261 = vmatpush3.bf16.msra.mxu1 %v2367_v38 }
 0x7b0   : > { %2286 = vmatprep.subr.bf16.mxu1 %v2416_v1 }
 0x862   : > { %v1303_v6 = vpop.f32.mrf.mxu1 }
 0x863   : > { %v1309_v7 = vpack.c.bf16 %v1303_v6, %v1303_v6 }
 0x864   : > { %v2236_v8 = vpop.f32.mrf.mxu1 }
 0x865   : > { %2243 = vmatmul.mubr.msk.bf16.vlgmr.msra.gmra.mxu0 %vm861_vm1, %v1309_v7 }
 0x866   : > { %v1306_v14 = vpop.f32.mrf.mxu1  ;;  %2254 = vmatprep.mubr.msk.bf16.mxu0 %vm2417_vm0, %v2416_v1 }
 0x868   : > { %v2237_v15 = vpop.f32.mrf.mxu1 }
 0x869   : > { %v1556_v15 = vsub.s32 7, %v2533_v11 }
 0x86a   : > { %v1410_v17 = vpop.f32.mrf.mxu1 }
 0x86b   : > { %v1416_v18 = vmul.f32 0.35355338, %v1410_v17  ;;  %v2852_v17 = vld [vmem:[%s2912_s2 + $0x8] sm:$0x1f] }
 0x86c   : > { %v2250_v19 = vpop.f32.mrf.mxu1  ;;  %v1873_v11 = vrot.slane %v2852_v17, 3 }
 0x86d   : > { %v1417_v21 = vadd.f32 %v1416_v18, %v2702_v40  ;;  %v1557_v19 = vrot.slane %v2541_v13, %v1556_v15  ;;  %v2377_v13 = vld [vmem:[%s2919_s9 + $0x30] sm:$0xff]  }
 0x86e   : > { %v1413_v22 = vpop.f32.mrf.mxu1 }
 0x86f   : > { %v1418_v23 = vsel %vm910_vm7, %v1417_v21, -inf }
 0x870   : > { %1419 = vmax.xlane.f32.xlu0 %v1418_v23  ;;  %v2251_v24 = vpop.f32.mrf.mxu1  ;;  %v1562_v23 = vrot.slane %v2852_v17, %v2536_v12  ;;  %v2378_v12 = vld [vmem:[%s2919_s9 + $0x28] sm:$0xff]  }
 0x886   : > { %1430 = vrot.lane.b32.xlu0 %v2682_v26, %s2422_s26 }
 0x8f9   : > { %v1420_v25 = vpop.xlane.xlu0 %1419 }
 0x8fa   : > { %v1421_v27 = vsub.f32 %v1417_v21, %v1420_v25 }
 0x8fc   : > { %v1422_v28 = vmul.f32 1.442695, %v1421_v27 }
 0x8fd   : > { %v1431_v29 = vpop.permute.xlu0 %1430 }
 0x8fe   : > { %2398 = vpow2.f32 %v1422_v28  ;;  %v1436_v30 = vsel %vm926_vm2, %v1431_v29, 0  ;;  %v2376_v28 = vld [vmem:[%s2919_s9 + $0x38] sm:$0xff]   ;;  %v2379_v29 = vld [vmem:[%s2919_s9 + $0x20] sm:$0xff]  }
 0x8ff   : > { %2253 = vmatpush3.bf16.msra.mxu0 %v1436_v30  ;;  %v2380_v30 = vld [vmem:[%s2919_s9 + $0x18] sm:$0xff]  }
 0x900   : > { %2266 = vmatprep.subr.bf16.mxu0 %v2416_v1 }
 0x90b   : > { %v2399_v31 = vpop.eup %2398 }
 0x90c   : > { %v1424_v40 = vsel %vm910_vm7, %v2399_v31, 0.0 }
 0x90d   : > { %1425 = vadd.xlane.f32.xlu1 %v1424_v40  ;;  %v2382_v40 = vld [vmem:[%s2919_s9 + $0x8] sm:$0xff]  }
 0x925   : > { %v1359_v33 = vpop.f32.mrf.mxu0 }
 0x926   : > { %v1365_v35 = vadd.f32 %v1359_v33, %v1192_v32  ;;  %v2383_v32 = vld [vmem:[%s2919_s9] sm:$0xff]   ;;  %v1584_v33 = vrot.slane %v2852_v17, %v509_v44  ;;  %v1866_v44 = vsel %vm1865_vm8, %v2696_v34, 0.0 }
 0x927   : > { %v2244_v26 = vpop.f32.mrf.mxu0  ;;  %1867 = vadd.xlane.f32.xlu0 %v1866_v44 }
 0x929   : > { %v1362_v36 = vpop.f32.mrf.mxu0 }
 0x92b   : > { %v2245_v39 = vpop.f32.mrf.mxu0 }
 0x996   : > { %v1426_v41 = vpop.xlane.xlu1 %1425 }
 0x997   : > { %2400 = vrcp.f32 %v1426_v41 }
 0x9a4   : > { %v2401_v42 = vpop.eup %2400 }
 0x9a5   : > { %v1428_v46 = vmul.f32 %v2401_v42, %v2399_v31  ;;  %v2381_v31 = vld [vmem:[%s2919_s9 + $0x10] sm:$0xff]  }
 0x9a7   : > { %v1429_v47 = vpack.c.bf16 %v1428_v46, %v1428_v46 }
 0x9a9   : > { %2255 = vmatmul.mubr.msk.bf16.vlgmr.msra.gmra.mxu0 %vm910_vm7, %v1429_v47 }
 0x9aa   : > { %2282 = vmatprep.mubr.msk.bf16.mxu0 %vm2417_vm0, %v2416_v1  ;;  %2267 = vmatpush3.bf16.msra.mxu0 %v2368_v61 }
 0x9ab   : > { %2268 = vmatprep.subr.bf16.mxu0 %v2416_v1 }
 0xa69   : > { %v1472_v43 = vpop.f32.mrf.mxu0 }
 0xa6a   : > { %v1478_v48 = vpack.c.bf16 %v1472_v43, %v1472_v43 }
 0xa6b   : > { %v2256_v10 = vpop.f32.mrf.mxu0 }
 0xa6c   : > { %2263 = vmatmul.mubr.msk.bf16.vlgmr.msra.gmra.mxu1 %vm861_vm1, %v1478_v48 }
 0xa6d   : > { %v1475_v49 = vpop.f32.mrf.mxu0  ;;  %2302 = vmatprep.mubr.msk.bf16.mxu1 %vm2417_vm0, %v2416_v1  ;;  %2287 = vmatpush3.bf16.msra.mxu1 %v2376_v28 }
 0xa6e   : > { %2288 = vmatprep.subr.bf16.mxu1 %v2416_v1 }
 0xa6f   : > { %v2257_v50 = vpop.f32.mrf.mxu0 }
 0xa70   : > { %v1702_v50 = vrot.slane %v2852_v17, %v514_v45 }
 0xa71   : > { %2289 = vmatpush3.bf16.msra.mxu1 %v2377_v13 }
 0xa72   : > { %2290 = vmatprep.subr.bf16.mxu1 %v2416_v1 }
 0xa75   : > { %2291 = vmatpush3.bf16.msra.mxu1 %v2378_v12 }
 0xa76   : > { %2292 = vmatprep.subr.bf16.mxu1 %v2416_v1 }
 0xa79   : > { %2293 = vmatpush3.bf16.msra.mxu1 %v2379_v29 }
 0xa7a   : > { %2294 = vmatprep.subr.bf16.mxu1 %v2416_v1 }
 0xa7d   : > { %2295 = vmatpush3.bf16.msra.mxu1 %v2380_v30 }
 0xa7e   : > { %2296 = vmatprep.subr.bf16.mxu1 %v2416_v1 }
 0xa81   : > { %2297 = vmatpush3.bf16.msra.mxu1 %v2381_v31 }
 0xa82   : > { %2298 = vmatprep.subr.bf16.mxu1 %v2416_v1 }
 0xa85   : > { %2299 = vmatpush3.bf16.msra.mxu1 %v2382_v40 }
 0xa86   : > { %2300 = vmatprep.subr.bf16.mxu1 %v2416_v1 }
 0xa89   : > { %2301 = vmatpush3.bf16.msra.mxu1 %v2383_v32 }
 0xb2c   : > { %v1528_v52 = vpop.f32.mrf.mxu1 }
 0xb2d   : > { %v1534_v53 = vadd.f32 %v1528_v52, %v1365_v35 }
 0xb2e   : > { %v2264_v55 = vpop.f32.mrf.mxu1 }
 0xb2f   : > { %v1535_v56 = vadd.f32 %v1534_v53, %v2545_v16  ;;  %v2369_v16 = vld [vmem:[%s2918_s8 + $0x30] sm:$0xff]  }
 0xb30   : > { %v1531_v57 = vpop.f32.mrf.mxu1  ;;  %2269 = vmatpush3.bf16.msra.mxu0 %v2369_v16 }
 0xb31   : > { %v2811_v58 = vadd.f32 %v1539_v54, %v1535_v56  ;;  %2270 = vmatprep.subr.bf16.mxu0 %v2416_v1  ;;  %v1868_v57 = vpop.xlane.xlu0 %1867 }
 0xb32   : > { %v2265_v59 = vpop.f32.mrf.mxu1 }
 0xb33   : > { %1541 = vadd.xlane.f32.xlu1 %v2811_v58  ;;  %v1544_v60 = vmul.f32 %v2811_v58, %v2811_v58  ;;  %v1869_v59 = vmax.f32 %v1868_v57, 1.0 }
 0xb34   : > { %2271 = vmatpush3.bf16.msra.mxu0 %v2370_v20 }
 0xb35   : > { %2272 = vmatprep.subr.bf16.mxu0 %v2416_v1 }
 0xb37   : > { %1545 = vadd.xlane.f32.xlu1 %v1544_v60 }
 0xb38   : > { %2273 = vmatpush3.bf16.msra.mxu0 %v2371_v62 }
 0xb39   : > { %2274 = vmatprep.subr.bf16.mxu0 %v2416_v1 }
 0xb3c   : > { %2275 = vmatpush3.bf16.msra.mxu0 %v2372_v63 }
 0xb3d   : > { %2276 = vmatprep.subr.bf16.mxu0 %v2416_v1 }
 0xb40   : > { %2277 = vmatpush3.bf16.msra.mxu0 %v2373_v0 }
 0xb41   : > { %2278 = vmatprep.subr.bf16.mxu0 %v2416_v1 }
 0xb44   : > { %2279 = vmatpush3.bf16.msra.mxu0 %v2374_v2 }
 0xb45   : > { %2280 = vmatprep.subr.bf16.mxu0 %v2416_v1 }
 0xb48   : > { %2281 = vmatpush3.bf16.msra.mxu0 %v2375_v3 }
 0xb49   : > { %2306 = vmatprep.subr.mxu0 %v2416_v1 }
 0xbbc   : > { %v1542_v4 = vpop.xlane.xlu1 %1541 }
 0xbbd   : > { %v1543_v9 = vmul.f32 0.03125, %v1542_v4 }
 0xbbf   : > { %v1548_v6 = vmul.f32 %v1543_v9, %v1543_v9  ;;  %v1550_v18 = vsub.f32 %v2811_v58, %v1543_v9 }
 0xbc0   : > { %v1546_v5 = vpop.xlane.xlu1 %1545 }
 0xbc1   : > { %v1547_v7 = vmul.f32 0.03125, %v1546_v5 }
 0xbc3   : > { %v1549_v8 = vsub.f32 %v1547_v7, %v1548_v6 }
 0xbc5   : > { %v1551_v14 = vadd.f32 1e-05, %v1549_v8 }
 0xbc7   : > { %2402 = vrsqrt.f32 %v1551_v14 }
 0xbd4   : > { %v2403_v21 = vpop.eup %2402 }
 0xbd5   : > { %v1553_v22 = vmul.f32 %v2403_v21, %v1550_v18 }
 0xbd7   : > { %v1558_v24 = vmul.f32 %v1557_v19, %v1553_v22 }
 0xbd9   : > { %v1563_v25 = vadd.f32 %v1562_v23, %v1558_v24 }
 0xbdb   : > { %v1564_v27 = vpack.c.bf16 %v1563_v25, %v1563_v25 }
 0xbdd   : > { %2283 = vmatmul.mubr.bf16.vlgmr.msra.gmra.mxu0 %v1564_v27 }
 0xbde   : > { %2308 = vmatprep.mubr.msk.f32.mxu0 %vm2417_vm0, %v2416_v1 }
 0xc9d   : > { %v1667_v35 = vpop.f32.mrf.mxu0 }
 0xc9e   : > { %v1668_v26 = vadd.f32 %v1667_v35, %v1584_v33 }
 0xc9f   : > { %v2284_v36 = vpop.f32.mrf.mxu0 }
 0xca0   : > { %v1673_v37 = vmul.f32 %v1668_v26, %v1668_v26 }
 0xca1   : > { %v1670_v39 = vpop.f32.mrf.mxu0 }
 0xca2   : > { %v1674_v41 = vmul.f32 %v1673_v37, %v1668_v26 }
 0xca3   : > { %v2285_v42 = vpop.f32.mrf.mxu0 }
 0xca4   : > { %v1675_v46 = vmul.f32 0.044715, %v1674_v41 }
 0xca6   : > { %v1676_v47 = vadd.f32 %v1675_v46, %v1668_v26 }
 0xca8   : > { %v1677_v38 = vmul.f32 0.7978846, %v1676_v47 }
 0xcaa   : > { %2404 = vtanh.f32 %v1677_v38 }
 0xcab   : > { %2406 = vrcp.f32 %v1869_v59 }
 0xcb7   : > { %v2405_v43 = vpop.eup %2404 }
 0xcb8   : > { %v1679_v48 = vadd.f32 1.0, %v2405_v43  ;;  %v2407_v60 = vpop.eup %2406 }
 0xcba   : > { %v1680_v10 = vmul.f32 0.5, %v1679_v48 }
 0xcbc   : > { %v1681_v1 = vmul.f32 %v1680_v10, %v1668_v26 }
 0xcbe   : > { %v1682_v49 = vpack.c.bf16 %v1681_v1, %v1681_v1 }
 0xcc0   : > { %2303 = vmatmul.mubr.bf16.vlgmr.msra.gmra.mxu1 %v1682_v49 }
 0xd80   : > { %v1785_v51 = vpop.f32.mrf.mxu1 }
 0xd81   : > { %v1786_v52 = vadd.f32 %v1785_v51, %v1702_v50 }
 0xd82   : > { %v2304_v53 = vpop.f32.mrf.mxu1 }
 0xd83   : > { %v1791_v54 = vadd.f32 %v1786_v52, %v2811_v58  ;;  %v1880_v58 = vrot.slane %v2852_v17, 4 }
 0xd84   : > { %v1788_v55 = vpop.f32.mrf.mxu1 }
 0xd85   : > { %2307 = vmatpush3.msra.mxu0 %v1791_v54 }
 0xd86   : > { %v2305_v56 = vpop.f32.mrf.mxu1  ;;  %2309 = vmatmul.mubr.msk.f32.vlgmr.msra.gmra.mxu0 %vm910_vm7, %v2696_v34 }
 0xe46   : > { %v1861_v61 = vpop.f32.mrf.mxu0 }
 0xe47   : > { %v1871_v45 = vmul.f32 %v2407_v60, %v1861_v61 }
 0xe48   : > { %v2310_v16 = vpop.f32.mrf.mxu0 }
 0xe49   : > { %v1875_v20 = vmul.f32 %v1873_v11, %v1871_v45 }
 0xe4b   : > { %v1877_v62 = vsel %vm1876_vm9, %v1875_v20, 0.0 }
 0xe4c   : > { %1878 = vadd.xlane.f32.xlu1 %v1877_v62 }
 0xed5   : > { %v1879_v63 = vpop.xlane.xlu1 %1878 }
 0xed6   : > { %v1882_v0 = vadd.f32 %v1880_v58, %v1879_v63 }
 0xed8   : > { %1885 = vperm.xlu1 %2326, %v1882_v0  }
 0xf53   : > { %v1886_v34 = vpop.permute.xlu1 %1885 }
 0xf54   : > { %1888 = vst [vmem:[%s366_s17] sm:$0x1] %v1886_v34 }
 0xf55 PF: > { %s20_s13 = sadd.s32 1, %s2414_s13  }
 0xf56   : > { %p17_p4 = scmp.ge.s32.totalorder %s20_s13, 4  }
 0xf58   :  { %19 = sbr.rel (!%p17_p4) target bundleno = 1 (0x1), region = 93 }

</bundles_post_ra>
